<compile_context>
chip_gen: v7x
topology: tpu7x:2x2x1
jax: 0.10.0
libtpu: 0.0.40
codegen_flags: <defaults>
</compile_context>

<pallas_src>
import jax
import jax.numpy as jnp
from jax.experimental import pallas as pl
from jax.experimental.pallas import tpu as pltpu  # noqa: F401  (TPU backend)


# ---------------------------------------------------------------------------
# The whole Generator forward as one Pallas kernel (no grid, VMEM resident).
# ---------------------------------------------------------------------------
def _generator_kernel(zb_ref, w1_ref, w2_ref, w3_ref, w4_ref,
                      g1_ref, b1_ref, g2_ref, b2_ref, g3_ref, b3_ref,
                      out_ref):
    f32 = jnp.float32
    eps = f32(1e-5)

    def fold4(v):
        # v: (1, 4*C) column-stacked over 4 taps -> per-channel totals,
        # broadcast back to all 4 tap blocks.  Only static lane slices + a
        # lane concat (same op pattern as RoPE half-rotations).
        c = v.shape[1] // 4
        g = v[:, 0:c] + v[:, c:2 * c] + v[:, 2 * c:3 * c] + v[:, 3 * c:4 * c]
        return jnp.concatenate([g, g, g, g], axis=1)

    def bn_relu(x, g, b, n, fold_taps=False):
        # PyTorch training-mode BatchNorm2d (biased variance), single pass:
        # var = E[x^2] - mean^2.  Stats reduce over rows; when the layer's
        # taps are column-stacked, fold4 also reduces over the 4 tap groups.
        s = jnp.sum(x, axis=0, keepdims=True)
        ss = jnp.sum(x * x, axis=0, keepdims=True)
        if fold_taps:
            s = fold4(s)
            ss = fold4(ss)
        inv_n = f32(1.0 / n)
        mean = s * inv_n
        var = ss * inv_n - mean * mean
        scale = g * jax.lax.rsqrt(var + eps)
        shift = b - mean * scale
        return jnp.maximum(x * scale + shift, f32(0.0))

    nrow1 = zb_ref.shape[0]          # 16*B   rows = (b, t1)
    nrow2 = 4 * nrow1                # 64*B   rows = (t2, b, t1)

    # -- layer 1: ConvT(128->256, k=4, s=1) on a 1x1 input.  zb is the latent
    #    block-expanded over the 16 taps (host side) and w1 is the matching
    #    ((t1, cin), cout) packing, so one bf16 matmul yields all tap outputs
    #    with rows already in (b, t1) order -- no in-kernel scatter/reshape.
    x1 = jnp.dot(zb_ref[...], w1_ref[...],
                 preferred_element_type=f32)                      # (16B, 256)
    x1 = bn_relu(x1, g1_ref[...], b1_ref[...], nrow1)

    # -- layer 2: ConvT(256->128, k=2, s=2): single matmul with the 4 taps
    #    stacked on lanes, then 4 aligned 128-lane slices stacked on sublanes.
    y2 = jnp.dot(x1.astype(jnp.bfloat16), w2_ref[...],
                 preferred_element_type=f32)                      # (16B, 512)
    x2 = jnp.concatenate(
        [y2[:, t * 128:(t + 1) * 128] for t in range(4)], axis=0)  # (64B, 128)
    x2 = bn_relu(x2, g2_ref[...], b2_ref[...], nrow2)

    # -- layer 3: ConvT(128->64, k=2, s=2): stays column-stacked, cols =
    #    (t3, c3); BN folds the 4 tap groups into per-channel stats.
    y3 = jnp.dot(x2.astype(jnp.bfloat16), w3_ref[...],
                 preferred_element_type=f32)                      # (64B, 256)
    x3 = bn_relu(y3, g3_ref[...], b3_ref[...], 4 * nrow2, fold_taps=True)

    # -- layer 4: ConvT(64->3, k=2, s=2) + tanh.  w4 is block-diagonal over t3
    #    so the whole layer is one (64B,256)@(256,48) matmul and the output is
    #    a single 48-lane-dense slab (tanh fused, no extra HBM round trip).
    y4 = jnp.dot(x3.astype(jnp.bfloat16), w4_ref[...],
                 preferred_element_type=f32)                      # (64B, 48)
    out_ref[...] = jnp.tanh(y4)


# ---------------------------------------------------------------------------
# Parameters (PyTorch layouts) + one-time host-side repacking for the kernel.
# ---------------------------------------------------------------------------
def init_params(key):
    k1, k2, k3, k4 = jax.random.split(key, 4)
    return {
        # ConvTranspose2d weight layout: (Cin, Cout, kH, kW), bias=False
        "w1": jax.random.normal(k1, (128, 256, 4, 4), jnp.float32) * 0.05,
        "w2": jax.random.normal(k2, (256, 128, 2, 2), jnp.float32) * 0.05,
        "w3": jax.random.normal(k3, (128, 64, 2, 2), jnp.float32) * 0.05,
        "w4": jax.random.normal(k4, (64, 3, 2, 2), jnp.float32) * 0.05,
        # BatchNorm2d default init: weight=1, bias=0
        "g1": jnp.ones((256,), jnp.float32), "b1": jnp.zeros((256,), jnp.float32),
        "g2": jnp.ones((128,), jnp.float32), "b2": jnp.zeros((128,), jnp.float32),
        "g3": jnp.ones((64,), jnp.float32),  "b3": jnp.zeros((64,), jnp.float32),
    }


def pack_params(p):
    """Hoisted (one-time) weight repacking into kernel-friendly bf16 layouts."""
    bf16 = jnp.bfloat16
    # layer 1: ((t1, cin), cout) with t1 = kh1*4 + kw1  -> (2048, 256)
    w1 = p["w1"].transpose(2, 3, 0, 1).reshape(16 * 128, 256)
    # layer 2: (c1, (t2, c2)) with t2 = kh2*2 + kw2     -> (256, 512)
    w2 = p["w2"].transpose(0, 2, 3, 1).reshape(256, 4 * 128)
    # layer 3: (c2, (t3, c3)) with t3 = kh3*2 + kw3     -> (128, 256)
    w3 = p["w3"].transpose(0, 2, 3, 1).reshape(128, 4 * 64)
    # layer 4: block-diagonal over t3: (256, 48), col = t3*12 + t4*3 + c
    w4p = p["w4"].transpose(0, 2, 3, 1).reshape(64, 12)
    w4 = jnp.einsum("ab,cd->acbd", jnp.eye(4, dtype=w4p.dtype), w4p).reshape(256, 48)
    return {
        "w1": w1.astype(bf16), "w2": w2.astype(bf16),
        "w3": w3.astype(bf16), "w4": w4.astype(bf16),
        # BN params in f32; gamma3/beta3 tiled to the column-stacked layout.
        "g1": p["g1"].reshape(1, 256), "b1": p["b1"].reshape(1, 256),
        "g2": p["g2"].reshape(1, 128), "b2": p["b2"].reshape(1, 128),
        "g3": jnp.tile(p["g3"], 4).reshape(1, 256),
        "b3": jnp.tile(p["b3"], 4).reshape(1, 256),
    }


# ---------------------------------------------------------------------------
# Forward: one pallas_call + one tiny XLA un-shuffle of the 24 KiB output.
# ---------------------------------------------------------------------------
@jax.jit
def generator_forward(packed, x_nchw):
    B = x_nchw.shape[0]
    z = x_nchw.reshape(B, 128).astype(jnp.bfloat16)

    # Block-expand the latent over the 16 layer-1 taps: rows (b, t1), columns
    # (t1', cin), nonzero only when t1 == t1'.  This replaces the previous
    # in-kernel 16-way misaligned scatter with a plain (16B,2048) matmul LHS.
    eye = jnp.eye(16, dtype=jnp.bfloat16)
    zb = (eye[None, :, :, None] * z[:, None, None, :]).reshape(16 * B, 16 * 128)

    out_k = pl.pallas_call(
        _generator_kernel,
        out_shape=jax.ShapeDtypeStruct((64 * B, 48), jnp.float32),
    )(zb, packed["w1"], packed["w2"], packed["w3"], packed["w4"],
      packed["g1"], packed["b1"], packed["g2"], packed["b2"],
      packed["g3"], packed["b3"])

    # Undo the tracked tap stacking:
    #   rows = (kh2, kw2, b, kh1, kw1), cols = (kh3, kw3, kh4, kw4, c)
    # and H = 8*kh1 + 4*kh2 + 2*kh3 + kh4 (same for W)  -> NCHW (B, 3, 32, 32).
    out = out_k.reshape(2, 2, B, 4, 4, 2, 2, 2, 2, 3)
    out = out.transpose(2, 9, 3, 0, 5, 7, 4, 1, 6, 8)
    return out.reshape(B, 3, 32, 32)


# ---------------------------------------------------------------------------
# Pure-JAX f32 reference (same math, NCHW) used as an in-script check.
# ---------------------------------------------------------------------------
def _reference_forward(params, x_nchw):
    hp = jax.lax.Precision.HIGHEST

    def convt(x, w, k):
        # kernel_size == stride (or 1x1 input): no overlapping taps.
        y = jnp.einsum("bchw,cdij->bdhiwj", x, w, precision=hp)
        B, Co, H, _, W, _ = y.shape
        return y.reshape(B, Co, H * k, W * k)

    def bn_relu(x, g, b):
        mean = x.mean(axis=(0, 2, 3), keepdims=True)
        var = ((x - mean) ** 2).mean(axis=(0, 2, 3), keepdims=True)
        y = (x - mean) * jax.lax.rsqrt(var + 1e-5)
        y = y * g.reshape(1, -1, 1, 1) + b.reshape(1, -1, 1, 1)
        return jnp.maximum(y, 0.0)

    x = x_nchw.astype(jnp.float32)
    x = bn_relu(convt(x, params["w1"], 4), params["g1"], params["b1"])
    x = bn_relu(convt(x, params["w2"], 2), params["g2"], params["b2"])
    x = bn_relu(convt(x, params["w3"], 2), params["g3"], params["b3"])
    return jnp.tanh(convt(x, params["w4"], 2))


# ---------------------------------------------------------------------------
if __name__ == "__main__":
    key = jax.random.PRNGKey(0)
    pkey, xkey = jax.random.split(key)
    params = init_params(pkey)
    packed = pack_params(params)

    # latent input: (batch=2, channels=128, 1, 1) as the module's shapes imply
    x = jax.random.normal(xkey, (2, 128, 1, 1), jnp.float32)

    out = generator_forward(packed, x)
    out = jax.block_until_ready(out)

    assert out.shape == (2, 3, 32, 32), out.shape
    assert bool(jnp.all(jnp.isfinite(out)))
    assert bool(jnp.all(jnp.abs(out) <= 1.0))      # tanh range

    # structural/numerical check vs a plain-f32 JAX reference of the module.
    # Kernel uses bf16 weights/activations on the MXU (f32 accumulate + BN),
    # so allow a slightly looser tolerance; permutation bugs would be O(1).
    ref = _reference_forward(params, x)
    max_diff = float(jnp.max(jnp.abs(out - ref)))
    mean_diff = float(jnp.mean(jnp.abs(out - ref)))
    assert max_diff < 1e-1, f"max |diff| vs reference too large: {max_diff}"
    assert mean_diff < 1e-2, f"mean |diff| vs reference too large: {mean_diff}"

    print("KERNEL_OK")
</pallas_src>

<mosaic_0001>
module attributes {stable_mosaic.version = 11 : i64} {
  func.func @_generator_kernel(%arg0: memref<32x2048xbf16, #tpu.memory_space<vmem>>, %arg1: memref<2048x256xbf16, #tpu.memory_space<vmem>>, %arg2: memref<256x512xbf16, #tpu.memory_space<vmem>>, %arg3: memref<128x256xbf16, #tpu.memory_space<vmem>>, %arg4: memref<256x48xbf16, #tpu.memory_space<vmem>>, %arg5: memref<1x256xf32, #tpu.memory_space<vmem>>, %arg6: memref<1x256xf32, #tpu.memory_space<vmem>>, %arg7: memref<1x128xf32, #tpu.memory_space<vmem>>, %arg8: memref<1x128xf32, #tpu.memory_space<vmem>>, %arg9: memref<1x256xf32, #tpu.memory_space<vmem>>, %arg10: memref<1x256xf32, #tpu.memory_space<vmem>>, %arg11: memref<128x48xf32, #tpu.memory_space<vmem>>) attributes {dimension_semantics = [], scalar_prefetch = 0 : i64, scratch_operands = 0 : i64, tpu.core_type = #tpu.core_type<tc>} {
    %c0 = arith.constant 0 : index
    %c0_0 = arith.constant 0 : index
    %0 = vector.load %arg0[%c0, %c0_0] : memref<32x2048xbf16, #tpu.memory_space<vmem>>, vector<32x2048xbf16>
    %c0_1 = arith.constant 0 : index
    %c0_2 = arith.constant 0 : index
    %1 = vector.load %arg1[%c0_1, %c0_2] : memref<2048x256xbf16, #tpu.memory_space<vmem>>, vector<2048x256xbf16>
    %cst = arith.constant dense<0.000000e+00> : vector<32x256xf32>
    %2 = tpu.matmul %0, %1, %cst {dimension_numbers = #tpu.dot_dimension_numbers<[1], [0], [0], [1], [0, 0, 1, 1], [], []>} : vector<32x2048xbf16>, vector<2048x256xbf16>, vector<32x256xf32> -> vector<32x256xf32>
    %c0_3 = arith.constant 0 : index
    %c0_4 = arith.constant 0 : index
    %3 = vector.load %arg5[%c0_3, %c0_4] : memref<1x256xf32, #tpu.memory_space<vmem>>, vector<1x256xf32>
    %c0_5 = arith.constant 0 : index
    %c0_6 = arith.constant 0 : index
    %4 = vector.load %arg6[%c0_5, %c0_6] : memref<1x256xf32, #tpu.memory_space<vmem>>, vector<1x256xf32>
    %cst_7 = arith.constant dense<0.000000e+00> : vector<256xf32>
    %5 = vector.multi_reduction <add>, %2, %cst_7 [0] : vector<32x256xf32> to vector<256xf32>
    %6 = vector.shape_cast %5 : vector<256xf32> to vector<1x256xf32>
    %7 = arith.mulf %2, %2 : vector<32x256xf32>
    %cst_8 = arith.constant dense<0.000000e+00> : vector<256xf32>
    %8 = vector.multi_reduction <add>, %7, %cst_8 [0] : vector<32x256xf32> to vector<256xf32>
    %9 = vector.shape_cast %8 : vector<256xf32> to vector<1x256xf32>
    %cst_9 = arith.constant 3.125000e-02 : f32
    %10 = vector.broadcast %cst_9 : f32 to vector<1x256xf32>
    %11 = arith.mulf %6, %10 : vector<1x256xf32>
    %cst_10 = arith.constant 3.125000e-02 : f32
    %12 = vector.broadcast %cst_10 : f32 to vector<1x256xf32>
    %13 = arith.mulf %9, %12 : vector<1x256xf32>
    %14 = arith.mulf %11, %11 : vector<1x256xf32>
    %15 = arith.subf %13, %14 : vector<1x256xf32>
    %cst_11 = arith.constant 9.99999974E-6 : f32
    %16 = vector.broadcast %cst_11 : f32 to vector<1x256xf32>
    %17 = arith.addf %15, %16 : vector<1x256xf32>
    %18 = math.rsqrt %17 : vector<1x256xf32>
    %19 = arith.mulf %3, %18 : vector<1x256xf32>
    %20 = arith.mulf %11, %19 : vector<1x256xf32>
    %21 = arith.subf %4, %20 : vector<1x256xf32>
    %22 = vector.broadcast %19 : vector<1x256xf32> to vector<32x256xf32>
    %23 = arith.mulf %2, %22 : vector<32x256xf32>
    %24 = vector.broadcast %21 : vector<1x256xf32> to vector<32x256xf32>
    %25 = arith.addf %23, %24 : vector<32x256xf32>
    %cst_12 = arith.constant 0.000000e+00 : f32
    %26 = vector.broadcast %cst_12 : f32 to vector<32x256xf32>
    %27 = arith.maximumf %25, %26 : vector<32x256xf32>
    %28 = arith.truncf %27 : vector<32x256xf32> to vector<32x256xbf16>
    %c0_13 = arith.constant 0 : index
    %c0_14 = arith.constant 0 : index
    %29 = vector.load %arg2[%c0_13, %c0_14] : memref<256x512xbf16, #tpu.memory_space<vmem>>, vector<256x512xbf16>
    %cst_15 = arith.constant dense<0.000000e+00> : vector<32x512xf32>
    %30 = tpu.matmul %28, %29, %cst_15 {dimension_numbers = #tpu.dot_dimension_numbers<[1], [0], [0], [1], [0, 0, 1, 1], [], []>} : vector<32x256xbf16>, vector<256x512xbf16>, vector<32x512xf32> -> vector<32x512xf32>
    %31 = vector.extract_strided_slice %30 {offsets = [0, 0], sizes = [32, 128], strides = [1, 1]} : vector<32x512xf32> to vector<32x128xf32>
    %32 = vector.extract_strided_slice %30 {offsets = [0, 128], sizes = [32, 128], strides = [1, 1]} : vector<32x512xf32> to vector<32x128xf32>
    %33 = vector.extract_strided_slice %30 {offsets = [0, 256], sizes = [32, 128], strides = [1, 1]} : vector<32x512xf32> to vector<32x128xf32>
    %34 = vector.extract_strided_slice %30 {offsets = [0, 384], sizes = [32, 128], strides = [1, 1]} : vector<32x512xf32> to vector<32x128xf32>
    %35 = tpu.concatenate %31, %32, %33, %34 in 0 : vector<32x128xf32>, vector<32x128xf32>, vector<32x128xf32>, vector<32x128xf32> -> vector<128x128xf32>
    %c0_16 = arith.constant 0 : index
    %c0_17 = arith.constant 0 : index
    %36 = vector.load %arg7[%c0_16, %c0_17] : memref<1x128xf32, #tpu.memory_space<vmem>>, vector<1x128xf32>
    %c0_18 = arith.constant 0 : index
    %c0_19 = arith.constant 0 : index
    %37 = vector.load %arg8[%c0_18, %c0_19] : memref<1x128xf32, #tpu.memory_space<vmem>>, vector<1x128xf32>
    %cst_20 = arith.constant dense<0.000000e+00> : vector<128xf32>
    %38 = vector.multi_reduction <add>, %35, %cst_20 [0] : vector<128x128xf32> to vector<128xf32>
    %39 = vector.shape_cast %38 : vector<128xf32> to vector<1x128xf32>
    %40 = arith.mulf %35, %35 : vector<128x128xf32>
    %cst_21 = arith.constant dense<0.000000e+00> : vector<128xf32>
    %41 = vector.multi_reduction <add>, %40, %cst_21 [0] : vector<128x128xf32> to vector<128xf32>
    %42 = vector.shape_cast %41 : vector<128xf32> to vector<1x128xf32>
    %cst_22 = arith.constant 7.812500e-03 : f32
    %43 = vector.broadcast %cst_22 : f32 to vector<1x128xf32>
    %44 = arith.mulf %39, %43 : vector<1x128xf32>
    %cst_23 = arith.constant 7.812500e-03 : f32
    %45 = vector.broadcast %cst_23 : f32 to vector<1x128xf32>
    %46 = arith.mulf %42, %45 : vector<1x128xf32>
    %47 = arith.mulf %44, %44 : vector<1x128xf32>
    %48 = arith.subf %46, %47 : vector<1x128xf32>
    %cst_24 = arith.constant 9.99999974E-6 : f32
    %49 = vector.broadcast %cst_24 : f32 to vector<1x128xf32>
    %50 = arith.addf %48, %49 : vector<1x128xf32>
    %51 = math.rsqrt %50 : vector<1x128xf32>
    %52 = arith.mulf %36, %51 : vector<1x128xf32>
    %53 = arith.mulf %44, %52 : vector<1x128xf32>
    %54 = arith.subf %37, %53 : vector<1x128xf32>
    %55 = vector.broadcast %52 : vector<1x128xf32> to vector<128x128xf32>
    %56 = arith.mulf %35, %55 : vector<128x128xf32>
    %57 = vector.broadcast %54 : vector<1x128xf32> to vector<128x128xf32>
    %58 = arith.addf %56, %57 : vector<128x128xf32>
    %cst_25 = arith.constant 0.000000e+00 : f32
    %59 = vector.broadcast %cst_25 : f32 to vector<128x128xf32>
    %60 = arith.maximumf %58, %59 : vector<128x128xf32>
    %61 = arith.truncf %60 : vector<128x128xf32> to vector<128x128xbf16>
    %c0_26 = arith.constant 0 : index
    %c0_27 = arith.constant 0 : index
    %62 = vector.load %arg3[%c0_26, %c0_27] : memref<128x256xbf16, #tpu.memory_space<vmem>>, vector<128x256xbf16>
    %cst_28 = arith.constant dense<0.000000e+00> : vector<128x256xf32>
    %63 = tpu.matmul %61, %62, %cst_28 {dimension_numbers = #tpu.dot_dimension_numbers<[1], [0], [0], [1], [0, 0, 1, 1], [], []>} : vector<128x128xbf16>, vector<128x256xbf16>, vector<128x256xf32> -> vector<128x256xf32>
    %c0_29 = arith.constant 0 : index
    %c0_30 = arith.constant 0 : index
    %64 = vector.load %arg9[%c0_29, %c0_30] : memref<1x256xf32, #tpu.memory_space<vmem>>, vector<1x256xf32>
    %c0_31 = arith.constant 0 : index
    %c0_32 = arith.constant 0 : index
    %65 = vector.load %arg10[%c0_31, %c0_32] : memref<1x256xf32, #tpu.memory_space<vmem>>, vector<1x256xf32>
    %cst_33 = arith.constant dense<0.000000e+00> : vector<256xf32>
    %66 = vector.multi_reduction <add>, %63, %cst_33 [0] : vector<128x256xf32> to vector<256xf32>
    %67 = vector.shape_cast %66 : vector<256xf32> to vector<1x256xf32>
    %68 = arith.mulf %63, %63 : vector<128x256xf32>
    %cst_34 = arith.constant dense<0.000000e+00> : vector<256xf32>
    %69 = vector.multi_reduction <add>, %68, %cst_34 [0] : vector<128x256xf32> to vector<256xf32>
    %70 = vector.shape_cast %69 : vector<256xf32> to vector<1x256xf32>
    %71 = vector.extract_strided_slice %67 {offsets = [0, 0], sizes = [1, 64], strides = [1, 1]} : vector<1x256xf32> to vector<1x64xf32>
    %72 = vector.extract_strided_slice %67 {offsets = [0, 64], sizes = [1, 64], strides = [1, 1]} : vector<1x256xf32> to vector<1x64xf32>
    %73 = arith.addf %71, %72 : vector<1x64xf32>
    %74 = vector.extract_strided_slice %67 {offsets = [0, 128], sizes = [1, 64], strides = [1, 1]} : vector<1x256xf32> to vector<1x64xf32>
    %75 = arith.addf %73, %74 : vector<1x64xf32>
    %76 = vector.extract_strided_slice %67 {offsets = [0, 192], sizes = [1, 64], strides = [1, 1]} : vector<1x256xf32> to vector<1x64xf32>
    %77 = arith.addf %75, %76 : vector<1x64xf32>
    %78 = tpu.concatenate %77, %77, %77, %77 in 1 : vector<1x64xf32>, vector<1x64xf32>, vector<1x64xf32>, vector<1x64xf32> -> vector<1x256xf32>
    %79 = vector.extract_strided_slice %70 {offsets = [0, 0], sizes = [1, 64], strides = [1, 1]} : vector<1x256xf32> to vector<1x64xf32>
    %80 = vector.extract_strided_slice %70 {offsets = [0, 64], sizes = [1, 64], strides = [1, 1]} : vector<1x256xf32> to vector<1x64xf32>
    %81 = arith.addf %79, %80 : vector<1x64xf32>
    %82 = vector.extract_strided_slice %70 {offsets = [0, 128], sizes = [1, 64], strides = [1, 1]} : vector<1x256xf32> to vector<1x64xf32>
    %83 = arith.addf %81, %82 : vector<1x64xf32>
    %84 = vector.extract_strided_slice %70 {offsets = [0, 192], sizes = [1, 64], strides = [1, 1]} : vector<1x256xf32> to vector<1x64xf32>
    %85 = arith.addf %83, %84 : vector<1x64xf32>
    %86 = tpu.concatenate %85, %85, %85, %85 in 1 : vector<1x64xf32>, vector<1x64xf32>, vector<1x64xf32>, vector<1x64xf32> -> vector<1x256xf32>
    %cst_35 = arith.constant 0.001953125 : f32
    %87 = vector.broadcast %cst_35 : f32 to vector<1x256xf32>
    %88 = arith.mulf %78, %87 : vector<1x256xf32>
    %cst_36 = arith.constant 0.001953125 : f32
    %89 = vector.broadcast %cst_36 : f32 to vector<1x256xf32>
    %90 = arith.mulf %86, %89 : vector<1x256xf32>
    %91 = arith.mulf %88, %88 : vector<1x256xf32>
    %92 = arith.subf %90, %91 : vector<1x256xf32>
    %cst_37 = arith.constant 9.99999974E-6 : f32
    %93 = vector.broadcast %cst_37 : f32 to vector<1x256xf32>
    %94 = arith.addf %92, %93 : vector<1x256xf32>
    %95 = math.rsqrt %94 : vector<1x256xf32>
    %96 = arith.mulf %64, %95 : vector<1x256xf32>
    %97 = arith.mulf %88, %96 : vector<1x256xf32>
    %98 = arith.subf %65, %97 : vector<1x256xf32>
    %99 = vector.broadcast %96 : vector<1x256xf32> to vector<128x256xf32>
    %100 = arith.mulf %63, %99 : vector<128x256xf32>
    %101 = vector.broadcast %98 : vector<1x256xf32> to vector<128x256xf32>
    %102 = arith.addf %100, %101 : vector<128x256xf32>
    %cst_38 = arith.constant 0.000000e+00 : f32
    %103 = vector.broadcast %cst_38 : f32 to vector<128x256xf32>
    %104 = arith.maximumf %102, %103 : vector<128x256xf32>
    %105 = arith.truncf %104 : vector<128x256xf32> to vector<128x256xbf16>
    %c0_39 = arith.constant 0 : index
    %c0_40 = arith.constant 0 : index
    %106 = vector.load %arg4[%c0_39, %c0_40] : memref<256x48xbf16, #tpu.memory_space<vmem>>, vector<256x48xbf16>
    %cst_41 = arith.constant dense<0.000000e+00> : vector<128x48xf32>
    %107 = tpu.matmul %105, %106, %cst_41 {dimension_numbers = #tpu.dot_dimension_numbers<[1], [0], [0], [1], [0, 0, 1, 1], [], []>} : vector<128x256xbf16>, vector<256x48xbf16>, vector<128x48xf32> -> vector<128x48xf32>
    %108 = math.tanh %107 : vector<128x48xf32>
    %c0_42 = arith.constant 0 : index
    %c0_43 = arith.constant 0 : index
    %109 = vector.load %arg11[%c0_42, %c0_43] : memref<128x48xf32, #tpu.memory_space<vmem>>, vector<128x48xf32>
    tpu.vector_store %arg11[%c0_42, %c0_43], %108 {strides = array<i32>} : memref<128x48xf32, #tpu.memory_space<vmem>>, vector<128x48xf32>,
    return
  }
}

</mosaic_0001>

<bundles_post_ra>
// kernel: generator_forward.1
= control target key start
LH: loop header
LB: loop body
LE: loop exit
PB: predicated region body
PF: predicated region fallthrough
CT: control target
= control target key end

     0   :  { %16 = vsyncpa [#allocation3], 0  ;;  %s6060_s0 = inlined_call_operand.vmem [shape: bf16[32,2048], index: 0, kind: input, shape index: {}]   ;;  %s6061_s1 = inlined_call_operand.hbm [shape: bf16[2048,256], index: 1, kind: input, shape index: {}]   ;;  %s6062_s2 = inlined_call_operand.hbm [shape: bf16[256,512], index: 2, kind: input, shape index: {}]   ;;  %s6063_s3 = inlined_call_operand.hbm [shape: bf16[128,256], index: 3, kind: input, shape index: {}]   ;;  %s6064_s4 = inlined_call_operand.vmem [shape: bf16[256,48], index: 4, kind: input, shape index: {}]   ;;  %s6065_s5 = inlined_call_operand.hbm [shape: f32[1,256], index: 5, kind: input, shape index: {}]   ;;  %s6066_s6 = inlined_call_operand.hbm [shape: f32[1,256], index: 6, kind: input, shape index: {}]   ;;  %s6067_s7 = inlined_call_operand.hbm [shape: f32[1,128], index: 7, kind: input, shape index: {}]   ;;  %s6068_s8 = inlined_call_operand.hbm [shape: f32[1,128], index: 8, kind: input, shape index: {}]   ;;  %s6069_s9 = inlined_call_operand.hbm [shape: f32[1,256], index: 9, kind: input, shape index: {}]   ;;  %s6070_s10 = inlined_call_operand.hbm [shape: f32[1,256], index: 10, kind: input, shape index: {}]   ;;  %s6071_s11 = inlined_call_operand.vmem [shape: f32[128,48], index: 11, kind: output, shape index: {}]  }
   0x1   :  { %17 = vsyncpa [#allocation5], 0 }
   0x2   :  { %18 = vsyncpa [#allocation8], 0 }
   0x3   :  { %19 = vsyncpa [#allocation11], 0 }
   0x4   :  { %20 = vsyncpa [#allocation14], 0  ;;  %s5170_s17 = smov [#allocation4]   ;;  %s4962_s21 = scalar_lea.hbm %s6062_s2, 8192 }
   0x5   :  { %s40_s18 = sshll.u32 %s5170_s17, 4  ;;  %p4963_p0 = scmp.ne.s32.totalorder %s6062_s2, %s4962_s21  ;;  %s41_s18 = int_to_ptr.vmem [resolvable:$true] %s40_s18 }
   0x6   :  { %p4966_p1 = scmp.lt.u32.totalorder %s4962_s21, %s6062_s2 }
   0x8   :  { %p4968_p2 = pnand %p4966_p1, %p4963_p0 }
   0xa   :  { %4971 = shalt.err (!%p4968_p2)
}
   0xb   :  { %s4972_s26 = scalar_lea.vmem %s41_s18, 8192  ;;  %p4977_p4 = scmp.lt.s32.totalorder %s41_s18, %s41_s18 }
   0xc   :  { %p4973_p3 = scmp.ne.s32.totalorder %s41_s18, %s4972_s26  ;;  %p4978_p5 = scmp.lt.s32.totalorder %s4972_s26, %s4972_s26 }
   0xe   :  { %p4979_p6 = por %p4978_p5, %p4977_p4 }
  0x10   :  { %p4980_p7 = pnand %p4979_p6, %p4973_p3 }
  0x12   :  { %4983 = shalt.err (!%p4980_p7)
}
  0x13   :  { %s5171_s27 = smov 256   ;;  %s5172_s28 = smov 16  }
  0x14   :  { %46 = dma.hbm_to_vmem [thread:$0]  %s6062_s2, 8192, %s41_s18, [#allocation5], %s5171_s27, %s5171_s27, %s5172_s28  }
  0x15   :  { %s5173_s12 = smov [#allocation7]   ;;  %s5174_s14 = smov [#allocation10]  }
  0x16   :  { %s67_s13 = sshll.u32 %s5173_s12, 4  ;;  %s87_s15 = sshll.u32 %s5174_s14, 4  ;;  %s68_s13 = int_to_ptr.vmem [resolvable:$true] %s67_s13  ;;  %s88_s15 = int_to_ptr.vmem [resolvable:$true] %s87_s15 }
  0x17   :  { %s4984_s19 = scalar_lea.hbm %s6065_s5, 32 }
  0x18   :  { %p4985_p8 = scmp.ne.s32.totalorder %s6065_s5, %s4984_s19  ;;  %p4988_p9 = scmp.lt.u32.totalorder %s4984_s19, %s6065_s5 }
  0x1a   :  { %p4990_p10 = pnand %p4988_p9, %p4985_p8 }
  0x1c   :  { %4993 = shalt.err (!%p4990_p10)
}
  0x1d   :  { %s4994_s2 = scalar_lea.vmem %s68_s13, 32  ;;  %p4999_p12 = scmp.lt.s32.totalorder %s68_s13, %s68_s13 }
  0x1e   :  { %p4995_p11 = scmp.ne.s32.totalorder %s68_s13, %s4994_s2  ;;  %p5000_p13 = scmp.lt.s32.totalorder %s4994_s2, %s4994_s2 }
  0x20   :  { %p5001_p0 = por %p5000_p13, %p4999_p12 }
  0x22   :  { %p5002_p1 = pnand %p5001_p0, %p4995_p11 }
  0x24   :  { %5005 = shalt.err (!%p5002_p1)
}
  0x25   :  { %70 = dma.hbm_to_vmem [thread:$0]  %s6065_s5, 32, %s68_s13, [#allocation8]  }
  0x26   :  { %s5006_s27 = scalar_lea.hbm %s6067_s7, 16 }
  0x27   :  { %p5007_p2 = scmp.ne.s32.totalorder %s6067_s7, %s5006_s27  ;;  %p5010_p3 = scmp.lt.u32.totalorder %s5006_s27, %s6067_s7 }
  0x29   :  { %p5012_p4 = pnand %p5010_p3, %p5007_p2 }
  0x2b   :  { %5015 = shalt.err (!%p5012_p4)
}
  0x2c   :  { %s5016_s14 = scalar_lea.vmem %s88_s15, 16  ;;  %s5020_s16 = scalar_lea.vmem %s88_s15, 32 }
  0x2d   :  { %p5017_p5 = scmp.ne.s32.totalorder %s88_s15, %s5016_s14  ;;  %p5021_p6 = scmp.lt.s32.totalorder %s88_s15, %s88_s15 }
  0x2e   :  { %p5022_p7 = scmp.lt.s32.totalorder %s5020_s16, %s5016_s14 }
  0x30   :  { %p5023_p8 = por %p5022_p7, %p5021_p6 }
  0x32   :  { %p5024_p9 = pnand %p5023_p8, %p5017_p5 }
  0x34   :  { %5027 = shalt.err (!%p5024_p9)
}
  0x35   :  { %90 = dma.hbm_to_vmem [thread:$0]  %s6067_s7, 16, %s88_s15, [#allocation11]  }
  0x36   :  { %s5175_s17 = smov [#allocation13]   ;;  %s5176_s20 = smov [#allocation2]  }
  0x37   :  { %s107_s19 = sshll.u32 %s5175_s17, 4  ;;  %s28_s21 = sshll.u32 %s5176_s20, 4  ;;  %s108_s19 = int_to_ptr.vmem [resolvable:$true] %s107_s19  ;;  %s29_s21 = int_to_ptr.vmem [resolvable:$true] %s28_s21 }
  0x38   :  { %s5028_s2 = scalar_lea.hbm %s6069_s9, 32 }
  0x39   :  { %p5029_p10 = scmp.ne.s32.totalorder %s6069_s9, %s5028_s2  ;;  %p5032_p11 = scmp.lt.u32.totalorder %s5028_s2, %s6069_s9 }
  0x3b   :  { %p5034_p12 = pnand %p5032_p11, %p5029_p10 }
  0x3d   :  { %5037 = shalt.err (!%p5034_p12)
}
  0x3e   :  { %s5038_s7 = scalar_lea.vmem %s108_s19, 32  ;;  %p5043_p0 = scmp.lt.s32.totalorder %s108_s19, %s108_s19 }
  0x3f   :  { %p5039_p13 = scmp.ne.s32.totalorder %s108_s19, %s5038_s7  ;;  %p5044_p1 = scmp.lt.s32.totalorder %s5038_s7, %s5038_s7 }
  0x41   :  { %p5045_p2 = por %p5044_p1, %p5043_p0 }
  0x43   :  { %p5046_p3 = pnand %p5045_p2, %p5039_p13 }
  0x45   :  { %5049 = shalt.err (!%p5046_p3)
}
  0x46   :  { %110 = dma.hbm_to_vmem [thread:$0]  %s6069_s9, 32, %s108_s19, [#allocation14]  }
  0x47   :  { %s5050_s30 = scalar_lea.hbm %s6061_s1, 32768 }
  0x48   :  { %p5051_p4 = scmp.ne.s32.totalorder %s6061_s1, %s5050_s30  ;;  %p5054_p5 = scmp.lt.u32.totalorder %s5050_s30, %s6061_s1 }
  0x4a   :  { %p5056_p6 = pnand %p5054_p5, %p5051_p4 }
  0x4c   :  { %5059 = shalt.err (!%p5056_p6)
}
  0x4d   :  { %s5060_s13 = scalar_lea.vmem %s29_s21, 32768  ;;  %p5065_p8 = scmp.lt.s32.totalorder %s29_s21, %s29_s21 }
  0x4e   :  { %p5061_p7 = scmp.ne.s32.totalorder %s29_s21, %s5060_s13  ;;  %p5066_p9 = scmp.lt.s32.totalorder %s5060_s13, %s5060_s13 }
  0x50   :  { %p5067_p10 = por %p5066_p9, %p5065_p8 }
  0x52   :  { %p5068_p11 = pnand %p5067_p10, %p5061_p7 }
  0x54   :  { %5071 = shalt.err (!%p5068_p11)
}
  0x55   :  { %s5177_s9 = smov 128   ;;  %s5178_s17 = smov 8  }
  0x56   :  { %34 = dma.hbm_to_vmem [thread:$0]  %s6061_s1, 32768, %s29_s21, [#allocation3], %s5177_s9, %s5177_s9, %s5178_s17  }
  0x57   :  { %s5179_s22 = smov [#allocation6]   ;;  %s5180_s2 = smov [#allocation9]  }
  0x58   :  { %s52_s23 = sshll.u32 %s5179_s22, 4  ;;  %s77_s18 = sshll.u32 %s5180_s2, 4  ;;  %s53_s23 = int_to_ptr.vmem [resolvable:$true] %s52_s23  ;;  %s78_s18 = int_to_ptr.vmem [resolvable:$true] %s77_s18 }
  0x59   :  { %s5072_s26 = scalar_lea.hbm %s6063_s3, 2048 }
  0x5a   :  { %p5073_p12 = scmp.ne.s32.totalorder %s6063_s3, %s5072_s26  ;;  %p5076_p13 = scmp.lt.u32.totalorder %s5072_s26, %s6063_s3 }
  0x5c   :  { %p5078_p0 = pnand %p5076_p13, %p5073_p12 }
  0x5e   :  { %5081 = shalt.err (!%p5078_p0)
}
  0x5f   :  { %s5082_s1 = scalar_lea.vmem %s53_s23, 2048  ;;  %p5087_p2 = scmp.lt.s32.totalorder %s53_s23, %s53_s23 }
  0x60   :  { %p5083_p1 = scmp.ne.s32.totalorder %s53_s23, %s5082_s1  ;;  %p5088_p3 = scmp.lt.s32.totalorder %s5082_s1, %s5082_s1 }
  0x62   :  { %p5089_p4 = por %p5088_p3, %p5087_p2 }
  0x64   :  { %p5090_p5 = pnand %p5089_p4, %p5083_p1 }
  0x66   :  { %5093 = shalt.err (!%p5090_p5)
}
  0x67   :  { %58 = dma.hbm_to_vmem [thread:$0]  %s6063_s3, 2048, %s53_s23, [#allocation5], %s5177_s9, %s5177_s9, %s5178_s17  }
  0x68   :  { %s5094_s14 = scalar_lea.hbm %s6066_s6, 32 }
  0x69   :  { %p5095_p6 = scmp.ne.s32.totalorder %s6066_s6, %s5094_s14  ;;  %p5098_p7 = scmp.lt.u32.totalorder %s5094_s14, %s6066_s6 }
  0x6b   :  { %p5100_p8 = pnand %p5098_p7, %p5095_p6 }
  0x6d   :  { %5103 = shalt.err (!%p5100_p8)
}
  0x6e   :  { %s5104_s20 = scalar_lea.vmem %s78_s18, 32  ;;  %p5109_p10 = scmp.lt.s32.totalorder %s78_s18, %s78_s18 }
  0x6f   :  { %p5105_p9 = scmp.ne.s32.totalorder %s78_s18, %s5104_s20  ;;  %p5110_p11 = scmp.lt.s32.totalorder %s5104_s20, %s5104_s20 }
  0x71   :  { %p5111_p12 = por %p5110_p11, %p5109_p10 }
  0x73   :  { %p5112_p13 = pnand %p5111_p12, %p5105_p9 }
  0x75   :  { %5115 = shalt.err (!%p5112_p13)
}
  0x76   :  { %80 = dma.hbm_to_vmem [thread:$0]  %s6066_s6, 32, %s78_s18, [#allocation8]  }
  0x77   :  { %s5181_s17 = smov [#allocation12]   ;;  %s5182_s23 = smov [#allocation15]  }
  0x78   :  { %s97_s22 = sshll.u32 %s5181_s17, 4  ;;  %s117_s2 = sshll.u32 %s5182_s23, 4  ;;  %s98_s22 = int_to_ptr.vmem [resolvable:$true] %s97_s22  ;;  %s118_s2 = int_to_ptr.vmem [resolvable:$true] %s117_s2 }
  0x79   :  { %s5116_s26 = scalar_lea.hbm %s6068_s8, 16 }
  0x7a   :  { %p5117_p0 = scmp.ne.s32.totalorder %s6068_s8, %s5116_s26  ;;  %p5120_p1 = scmp.lt.u32.totalorder %s5116_s26, %s6068_s8 }
  0x7c   :  { %p5122_p2 = pnand %p5120_p1, %p5117_p0 }
  0x7e   :  { %5125 = shalt.err (!%p5122_p2)
}
  0x7f   :  { %s5126_s6 = scalar_lea.vmem %s98_s22, 16  ;;  %s5130_s18 = scalar_lea.vmem %s98_s22, 32 }
  0x80   :  { %p5127_p3 = scmp.ne.s32.totalorder %s98_s22, %s5126_s6  ;;  %p5131_p4 = scmp.lt.s32.totalorder %s98_s22, %s98_s22 }
  0x81   :  { %p5132_p5 = scmp.lt.s32.totalorder %s5130_s18, %s5126_s6 }
  0x83   :  { %p5133_p6 = por %p5132_p5, %p5131_p4 }
  0x85   :  { %p5134_p7 = pnand %p5133_p6, %p5127_p3 }
  0x87   :  { %5137 = shalt.err (!%p5134_p7)
}
  0x88   :  { %100 = dma.hbm_to_vmem [thread:$0]  %s6068_s8, 16, %s98_s22, [#allocation11]  }
  0x89   :  { %s5138_s12 = scalar_lea.hbm %s6070_s10, 32 }
  0x8a   :  { %p5139_p8 = scmp.ne.s32.totalorder %s6070_s10, %s5138_s12  ;;  %p5142_p9 = scmp.lt.u32.totalorder %s5138_s12, %s6070_s10 }
  0x8c   :  { %p5144_p10 = pnand %p5142_p9, %p5139_p8 }
  0x8e   :  { %5147 = shalt.err (!%p5144_p10)
}
  0x8f   :  { %s5148_s19 = scalar_lea.vmem %s118_s2, 32  ;;  %p5153_p12 = scmp.lt.s32.totalorder %s118_s2, %s118_s2 }
  0x90   :  { %p5149_p11 = scmp.ne.s32.totalorder %s118_s2, %s5148_s19  ;;  %p5154_p13 = scmp.lt.s32.totalorder %s5148_s19, %s5148_s19 }
  0x92   :  { %p5155_p0 = por %p5154_p13, %p5153_p12 }
  0x94   :  { %p5156_p1 = pnand %p5155_p0, %p5149_p11 }
  0x96   :  { %5159 = shalt.err (!%p5156_p1)
}
  0x97   :  { %120 = dma.hbm_to_vmem [thread:$0]  %s6070_s10, 32, %s118_s2, [#allocation14]  }
  0x98   :  { %5160 = dma.done.wait [#allocation3], 32768  }
  0x99   :  { %5161 = vsyncadd [#allocation3], 4294934528 }
  0x9a   :  { %5162 = dma.done.wait [#allocation5], 10240  }
  0x9b   :  { %5163 = vsyncadd [#allocation5], 4294957056 }
  0x9c   :  { %5164 = dma.done.wait [#allocation8], 64  }
  0x9d   :  { %5165 = vsyncadd [#allocation8], 4294967232 }
  0x9e   :  { %5166 = dma.done.wait [#allocation11], 32  }
  0x9f   :  { %5167 = vsyncadd [#allocation11], 4294967264 }
  0xa0   :  { %5168 = dma.done.wait [#allocation14], 64  }
  0xa1   :  { %5169 = vsyncadd [#allocation14], 4294967232  ;;  %v4402_v0 = vld [vmem:[#allocation2 + $0x204] ss:$8 sps:$4 sm:$0xff]   ;;  %v4404_v1 = vld [vmem:[#allocation2 + $0x200] ss:$8 sps:$4 sm:$0xff]  }
  0xa2   :  { %1983 = vmatprep.subr.bf16.mxu0 %v4402_v0  ;;  %v4405_v2 = vld [vmem:[#allocation2 + $0x214] ss:$8 sps:$4 sm:$0xff]   ;;  %v4407_v3 = vld [vmem:[#allocation2 + $0x210] ss:$8 sps:$4 sm:$0xff]   ;;  %v4408_v4 = vld [vmem:[#allocation2 + $0x224] ss:$8 sps:$4 sm:$0xff]  }
  0xa3   :  { %1984 = vmatpush1.bf16.msra.mxu0 %v4404_v1  ;;  %v4410_v5 = vld [vmem:[#allocation2 + $0x220] ss:$8 sps:$4 sm:$0xff]   ;;  %v4411_v6 = vld [vmem:[#allocation2 + $0x234] ss:$8 sps:$4 sm:$0xff]   ;;  %v4413_v7 = vld [vmem:[#allocation2 + $0x230] ss:$8 sps:$4 sm:$0xff]  }
  0xa4   :  { %1985 = vmatprep.subr.bf16.mxu0 %v4405_v2  ;;  %v4414_v8 = vld [vmem:[#allocation2 + $0x244] ss:$8 sps:$4 sm:$0xff]   ;;  %v4416_v9 = vld [vmem:[#allocation2 + $0x240] ss:$8 sps:$4 sm:$0xff]   ;;  %v4417_v10 = vld [vmem:[#allocation2 + $0x254] ss:$8 sps:$4 sm:$0xff]  }
  0xa5   :  { %v4419_v11 = vld [vmem:[#allocation2 + $0x250] ss:$8 sps:$4 sm:$0xff]   ;;  %v4420_v12 = vld [vmem:[#allocation2 + $0x264] ss:$8 sps:$4 sm:$0xff]   ;;  %v4422_v16 = vld [vmem:[#allocation2 + $0x260] ss:$8 sps:$4 sm:$0xff]  }
  0xa6   :  { %v151_v13 = vld [vmem:[%s6060_s0 + $0x10] sm:$0xff]  ;;  %v4426_v19 = vld [vmem:[#allocation2 + $0x284] ss:$8 sps:$4 sm:$0xff]   ;;  %v4428_v20 = vld [vmem:[#allocation2 + $0x280] ss:$8 sps:$4 sm:$0xff]   ;;  %s5185_s28 = smov 64  }
  0xa7   :  { %1986 = vmatpush1.bf16.msra.mxu0 %v4407_v3  ;;  %v159_v14 = vld [vmem:[%s6060_s0 + $0x50] sm:$0xff]  ;;  %v4432_v23 = vld [vmem:[#allocation2 + $0x2a4] ss:$8 sps:$4 sm:$0xff]   ;;  %v4434_v24 = vld [vmem:[#allocation2 + $0x2a0] ss:$8 sps:$4 sm:$0xff]   ;;  %vm3418_vm0 = vcmask 523264  }
  0xa8   :  { %1987 = vmatprep.subr.bf16.mxu0 %v4408_v4  ;;  %v3887_v15 = vcombine.high %v151_v13, %v159_v14  ;;  %v4423_v17 = vld [vmem:[#allocation2 + $0x274] ss:$8 sps:$4 sm:$0xff]   ;;  %v4425_v18 = vld [vmem:[#allocation2 + $0x270] ss:$8 sps:$4 sm:$0xff]   ;;  %v4438_v27 = vld [vmem:[#allocation2 + $0x2c4] ss:$8 sps:$4 sm:$0xff]   ;;  %v3886_v38 = vcombine.low %v151_v13, %v159_v14 }
  0xa9   :  { %v4429_v21 = vld [vmem:[#allocation2 + $0x294] ss:$8 sps:$4 sm:$0xff]   ;;  %v4431_v22 = vld [vmem:[#allocation2 + $0x290] ss:$8 sps:$4 sm:$0xff]   ;;  %v4440_v28 = vld [vmem:[#allocation2 + $0x2c0] ss:$8 sps:$4 sm:$0xff]  }
  0xaa   :  { %2015 = vmatprep.mubr.bf16.mxu0 %v3887_v15  ;;  %v4435_v25 = vld [vmem:[#allocation2 + $0x2b4] ss:$8 sps:$4 sm:$0xff]   ;;  %v4437_v26 = vld [vmem:[#allocation2 + $0x2b0] ss:$8 sps:$4 sm:$0xff]   ;;  %v4444_v31 = vld [vmem:[#allocation2 + $0x2e4] ss:$8 sps:$4 sm:$0xff]  }
  0xab   :  { %1988 = vmatpush1.bf16.msra.mxu0 %v4410_v5  ;;  %v4441_v29 = vld [vmem:[#allocation2 + $0x2d4] ss:$8 sps:$4 sm:$0xff]   ;;  %v4443_v30 = vld [vmem:[#allocation2 + $0x2d0] ss:$8 sps:$4 sm:$0xff]   ;;  %v4446_v32 = vld [vmem:[#allocation2 + $0x2e0] ss:$8 sps:$4 sm:$0xff]  }
  0xac   :  { %1989 = vmatprep.subr.bf16.mxu0 %v4411_v6  ;;  %v4447_v33 = vld [vmem:[#allocation2 + $0x2f4] ss:$8 sps:$4 sm:$0xff]   ;;  %v4449_v34 = vld [vmem:[#allocation2 + $0x2f0] ss:$8 sps:$4 sm:$0xff]   ;;  %v4452_v35 = vld [vmem:[#allocation2 + $0x304] ss:$8 sps:$4 sm:$0xff]  }
  0xad   :  { %v167_v36 = vld [vmem:[%s6060_s0 + $0x90] sm:$0xff]  ;;  %v4450_v39 = vld [vmem:[#allocation2 + $0x300] ss:$8 sps:$4 sm:$0xff]   ;;  %v4458_v43 = vld [vmem:[#allocation2 + $0x324] ss:$8 sps:$4 sm:$0xff]   ;;  %vm3856_vm1 = vcmask 392192  }
  0xae   :  { %v175_v37 = vld [vmem:[%s6060_s0 + $0xd0] sm:$0xff]  ;;  %v4546_v44 = vld [vmem:[#allocation2 + $0x4] ss:$8 sps:$4 sm:$0xff]   ;;  %v4548_v45 = vld [vmem:[#allocation2] ss:$8 sps:$4 sm:$0xff]  }
  0xaf   :  { %1990 = vmatpush1.bf16.msra.mxu0 %v4413_v7  ;;  %v3903_v40 = vcombine.high %v167_v36, %v175_v37  ;;  %v4455_v41 = vld [vmem:[#allocation2 + $0x314] ss:$8 sps:$4 sm:$0xff]   ;;  %v4453_v42 = vld [vmem:[#allocation2 + $0x310] ss:$8 sps:$4 sm:$0xff]   ;;  %v4456_v48 = vld [vmem:[#allocation2 + $0x320] ss:$8 sps:$4 sm:$0xff]   ;;  %1877 = vmatprep.subr.bf16.mxu1 %v4546_v44  ;;  %v3902_v49 = vcombine.low %v167_v36, %v175_v37 }
  0xb0   :  { %1991 = vmatprep.subr.bf16.mxu0 %v4414_v8  ;;  %v5369_v46 = vld [vmem:[%s6060_s0 + $0x18] sm:$0xff]  ;;  %1878 = vmatpush1.bf16.msra.mxu1 %v4548_v45  ;;  %v4558_v54 = vld [vmem:[#allocation2 + $0x24] ss:$8 sps:$4 sm:$0xff]   ;;  %v4560_v55 = vld [vmem:[#allocation2 + $0x20] ss:$8 sps:$4 sm:$0xff]  }
  0xb1   :  { %v5374_v47 = vld [vmem:[%s6060_s0 + $0x58] sm:$0xff]  ;;  %v4464_v57 = vld [vmem:[#allocation2 + $0x344] ss:$8 sps:$4 sm:$0xff]   ;;  %v4462_v59 = vld [vmem:[#allocation2 + $0x340] ss:$8 sps:$4 sm:$0xff]  }
  0xb2   :  { %v4552_v50 = vld [vmem:[#allocation2 + $0x14] ss:$8 sps:$4 sm:$0xff]   ;;  %v3889_v51 = vcombine.high %v5369_v46, %v5374_v47  ;;  %v4554_v52 = vld [vmem:[#allocation2 + $0x10] ss:$8 sps:$4 sm:$0xff]   ;;  %v4570_v61 = vld [vmem:[#allocation2 + $0x44] ss:$8 sps:$4 sm:$0xff]  }
  0xb3   :  { %1992 = vmatpush1.bf16.msra.mxu0 %v4416_v9  ;;  %v4461_v53 = vld [vmem:[#allocation2 + $0x334] ss:$8 sps:$4 sm:$0xff]   ;;  %1879 = vmatprep.subr.bf16.mxu1 %v4552_v50  ;;  %v4459_v56 = vld [vmem:[#allocation2 + $0x330] ss:$8 sps:$4 sm:$0xff]   ;;  %v4572_v63 = vld [vmem:[#allocation2 + $0x40] ss:$8 sps:$4 sm:$0xff]  }
  0xb4   :  { %1993 = vmatprep.subr.bf16.mxu0 %v4417_v10  ;;  %1880 = vmatpush1.bf16.msra.mxu1 %v4554_v52  ;;  %v4564_v58 = vld [vmem:[#allocation2 + $0x34] ss:$8 sps:$4 sm:$0xff]   ;;  %v4566_v60 = vld [vmem:[#allocation2 + $0x30] ss:$8 sps:$4 sm:$0xff]   ;;  %v4470_v1 = vld [vmem:[#allocation2 + $0x364] ss:$8 sps:$4 sm:$0xff]  }
  0xb5   :  { %1881 = vmatprep.subr.bf16.mxu1 %v4558_v54  ;;  %v4467_v62 = vld [vmem:[#allocation2 + $0x354] ss:$8 sps:$4 sm:$0xff]   ;;  %v4465_v0 = vld [vmem:[#allocation2 + $0x350] ss:$8 sps:$4 sm:$0xff]   ;;  %v4468_v4 = vld [vmem:[#allocation2 + $0x360] ss:$8 sps:$4 sm:$0xff]  }
  0xb6   :  { %v4576_v2 = vld [vmem:[#allocation2 + $0x54] ss:$8 sps:$4 sm:$0xff]   ;;  %v4578_v3 = vld [vmem:[#allocation2 + $0x50] ss:$8 sps:$4 sm:$0xff]   ;;  %v4582_v6 = vld [vmem:[#allocation2 + $0x64] ss:$8 sps:$4 sm:$0xff]  }
  0xb7   :  { %1994 = vmatpush1.bf16.msra.mxu0 %v4419_v11  ;;  %v4473_v5 = vld [vmem:[#allocation2 + $0x374] ss:$8 sps:$4 sm:$0xff]   ;;  %v4584_v7 = vld [vmem:[#allocation2 + $0x60] ss:$8 sps:$4 sm:$0xff]   ;;  %v4471_v8 = vld [vmem:[#allocation2 + $0x370] ss:$8 sps:$4 sm:$0xff]  }
  0xb8   :  { %1995 = vmatprep.subr.bf16.mxu0 %v4420_v12  ;;  %1882 = vmatpush1.bf16.msra.mxu1 %v4560_v55  ;;  %v4476_v9 = vld [vmem:[#allocation2 + $0x384] ss:$8 sps:$4 sm:$0xff]   ;;  %v4588_v10 = vld [vmem:[#allocation2 + $0x74] ss:$8 sps:$4 sm:$0xff]   ;;  %v4590_v11 = vld [vmem:[#allocation2 + $0x70] ss:$8 sps:$4 sm:$0xff]  }
  0xb9   :  { %1883 = vmatprep.subr.bf16.mxu1 %v4564_v58  ;;  %v4474_v12 = vld [vmem:[#allocation2 + $0x380] ss:$8 sps:$4 sm:$0xff]   ;;  %v4479_v13 = vld [vmem:[#allocation2 + $0x394] ss:$8 sps:$4 sm:$0xff]   ;;  %v4594_v14 = vld [vmem:[#allocation2 + $0x84] ss:$8 sps:$4 sm:$0xff]  }
  0xba   :  { %v4596_v15 = vld [vmem:[#allocation2 + $0x80] ss:$8 sps:$4 sm:$0xff]   ;;  %v4630_v37 = vld [vmem:[#allocation2 + $0xe4] ss:$8 sps:$4 sm:$0xff]   ;;  %v4636_v44 = vld [vmem:[#allocation2 + $0xf4] ss:$8 sps:$4 sm:$0xff]  }
  0xbb   :  { %1996 = vmatpush1.bf16.msra.mxu0 %v4422_v16  ;;  %v4477_v16 = vld [vmem:[#allocation2 + $0x390] ss:$8 sps:$4 sm:$0xff]   ;;  %v4492_v36 = vld [vmem:[#allocation2 + $0x3e0] ss:$8 sps:$4 sm:$0xff]   ;;  %v4503_v54 = vld [vmem:[#allocation2 + $0x414] ss:$8 sps:$4 sm:$0xff]  }
  0xbc   :  { %1997 = vmatprep.subr.bf16.mxu0 %v4423_v17  ;;  %1884 = vmatpush1.bf16.msra.mxu1 %v4566_v60  ;;  %v4482_v17 = vld [vmem:[#allocation2 + $0x3a4] ss:$8 sps:$4 sm:$0xff]   ;;  %v4638_v50 = vld [vmem:[#allocation2 + $0xf0] ss:$8 sps:$4 sm:$0xff]   ;;  %v4498_v52 = vld [vmem:[#allocation2 + $0x400] ss:$8 sps:$4 sm:$0xff]  }
  0xbd   :  { %1885 = vmatprep.subr.bf16.mxu1 %v4570_v61  ;;  %v149_v45 = vld [vmem:[%s6060_s0] sm:$0xff]  ;;  %v4650_v60 = vld [vmem:[#allocation2 + $0x114] ss:$8 sps:$4 sm:$0xff]  }
  0xbe   :  { %v4644_v55 = vld [vmem:[#allocation2 + $0x104] ss:$8 sps:$4 sm:$0xff]  }
  0xbf   :  { %1998 = vmatpush1.bf16.msra.mxu0 %v4425_v18  ;;  %v4600_v18 = vld [vmem:[#allocation2 + $0x94] ss:$8 sps:$4 sm:$0xff]   ;;  %v4506_v58 = vld [vmem:[#allocation2 + $0x424] ss:$8 sps:$4 sm:$0xff]  }
  0xc0   :  { %1999 = vmatprep.subr.bf16.mxu0 %v4426_v19  ;;  %1886 = vmatpush1.bf16.msra.mxu1 %v4572_v63  ;;  %v4602_v19 = vld [vmem:[#allocation2 + $0x90] ss:$8 sps:$4 sm:$0xff]   ;;  %v4504_v63 = vld [vmem:[#allocation2 + $0x420] ss:$8 sps:$4 sm:$0xff]  }
  0xc1   :  { %1887 = vmatprep.subr.bf16.mxu1 %v4576_v2  ;;  %v4656_v2 = vld [vmem:[#allocation2 + $0x124] ss:$8 sps:$4 sm:$0xff]  }
  0xc3   :  { %2000 = vmatpush1.bf16.msra.mxu0 %v4428_v20  ;;  %v4480_v20 = vld [vmem:[#allocation2 + $0x3a0] ss:$8 sps:$4 sm:$0xff]  }
  0xc4   :  { %2001 = vmatprep.subr.bf16.mxu0 %v4429_v21  ;;  %1888 = vmatpush1.bf16.msra.mxu1 %v4578_v3  ;;  %v4485_v21 = vld [vmem:[#allocation2 + $0x3b4] ss:$8 sps:$4 sm:$0xff]   ;;  %v4654_v3 = vld [vmem:[#allocation2 + $0x120] ss:$8 sps:$4 sm:$0xff]  }
  0xc5   :  { %1889 = vmatprep.subr.bf16.mxu1 %v4582_v6  ;;  %v4662_v6 = vld [vmem:[#allocation2 + $0x134] ss:$8 sps:$4 sm:$0xff]  }
  0xc7   :  { %2002 = vmatpush1.bf16.msra.mxu0 %v4431_v22  ;;  %v4606_v22 = vld [vmem:[#allocation2 + $0xa4] ss:$8 sps:$4 sm:$0xff]  }
  0xc8   :  { %2003 = vmatprep.subr.bf16.mxu0 %v4432_v23  ;;  %1890 = vmatpush1.bf16.msra.mxu1 %v4584_v7  ;;  %v4608_v23 = vld [vmem:[#allocation2 + $0xa0] ss:$8 sps:$4 sm:$0xff]   ;;  %v4660_v7 = vld [vmem:[#allocation2 + $0x130] ss:$8 sps:$4 sm:$0xff]  }
  0xc9   :  { %1891 = vmatprep.subr.bf16.mxu1 %v4588_v10  ;;  %v4668_v10 = vld [vmem:[#allocation2 + $0x144] ss:$8 sps:$4 sm:$0xff]  }
  0xcb   :  { %2004 = vmatpush1.bf16.msra.mxu0 %v4434_v24  ;;  %v4483_v24 = vld [vmem:[#allocation2 + $0x3b0] ss:$8 sps:$4 sm:$0xff]  }
  0xcc   :  { %2005 = vmatprep.subr.bf16.mxu0 %v4435_v25  ;;  %1892 = vmatpush1.bf16.msra.mxu1 %v4590_v11  ;;  %v4488_v25 = vld [vmem:[#allocation2 + $0x3c4] ss:$8 sps:$4 sm:$0xff]   ;;  %v4666_v11 = vld [vmem:[#allocation2 + $0x140] ss:$8 sps:$4 sm:$0xff]  }
  0xcd   :  { %1893 = vmatprep.subr.bf16.mxu1 %v4594_v14  ;;  %v4674_v14 = vld [vmem:[#allocation2 + $0x154] ss:$8 sps:$4 sm:$0xff]  }
  0xcf   :  { %2006 = vmatpush1.bf16.msra.mxu0 %v4437_v26  ;;  %v4612_v26 = vld [vmem:[#allocation2 + $0xb4] ss:$8 sps:$4 sm:$0xff]  }
  0xd0   :  { %2007 = vmatprep.subr.bf16.mxu0 %v4438_v27  ;;  %1894 = vmatpush1.bf16.msra.mxu1 %v4596_v15  ;;  %v4614_v27 = vld [vmem:[#allocation2 + $0xb0] ss:$8 sps:$4 sm:$0xff]  }
  0xd1   :  { %1895 = vmatprep.subr.bf16.mxu1 %v4600_v18  ;;  %v4672_v15 = vld [vmem:[#allocation2 + $0x150] ss:$8 sps:$4 sm:$0xff]   ;;  %v4680_v18 = vld [vmem:[#allocation2 + $0x164] ss:$8 sps:$4 sm:$0xff]  }
  0xd3   :  { %2008 = vmatpush1.bf16.msra.mxu0 %v4440_v28  ;;  %v4486_v28 = vld [vmem:[#allocation2 + $0x3c0] ss:$8 sps:$4 sm:$0xff]  }
  0xd4   :  { %2009 = vmatprep.subr.bf16.mxu0 %v4441_v29  ;;  %1896 = vmatpush1.bf16.msra.mxu1 %v4602_v19  ;;  %v4491_v29 = vld [vmem:[#allocation2 + $0x3d4] ss:$8 sps:$4 sm:$0xff]   ;;  %v4678_v19 = vld [vmem:[#allocation2 + $0x160] ss:$8 sps:$4 sm:$0xff]  }
  0xd5   :  { %1897 = vmatprep.subr.bf16.mxu1 %v4606_v22  ;;  %v4686_v22 = vld [vmem:[#allocation2 + $0x174] ss:$8 sps:$4 sm:$0xff]  }
  0xd7   :  { %2010 = vmatpush1.bf16.msra.mxu0 %v4443_v30  ;;  %v4618_v30 = vld [vmem:[#allocation2 + $0xc4] ss:$8 sps:$4 sm:$0xff]  }
  0xd8   :  { %2011 = vmatprep.subr.bf16.mxu0 %v4444_v31  ;;  %1898 = vmatpush1.bf16.msra.mxu1 %v4608_v23  ;;  %v4620_v31 = vld [vmem:[#allocation2 + $0xc0] ss:$8 sps:$4 sm:$0xff]   ;;  %v4684_v23 = vld [vmem:[#allocation2 + $0x170] ss:$8 sps:$4 sm:$0xff]  }
  0xd9   :  { %1899 = vmatprep.subr.bf16.mxu1 %v4612_v26  ;;  %v4692_v26 = vld [vmem:[#allocation2 + $0x184] ss:$8 sps:$4 sm:$0xff]  }
  0xdb   :  { %2012 = vmatpush1.bf16.msra.mxu0 %v4446_v32  ;;  %v4489_v32 = vld [vmem:[#allocation2 + $0x3d0] ss:$8 sps:$4 sm:$0xff]  }
  0xdc   :  { %2013 = vmatprep.subr.bf16.mxu0 %v4447_v33  ;;  %1900 = vmatpush1.bf16.msra.mxu1 %v4614_v27  ;;  %v4494_v33 = vld [vmem:[#allocation2 + $0x3e4] ss:$8 sps:$4 sm:$0xff]   ;;  %v4690_v27 = vld [vmem:[#allocation2 + $0x180] ss:$8 sps:$4 sm:$0xff]  }
  0xdd   :  { %1901 = vmatprep.subr.bf16.mxu1 %v4618_v30  ;;  %v4698_v30 = vld [vmem:[#allocation2 + $0x194] ss:$8 sps:$4 sm:$0xff]  }
  0xdf   :  { %2014 = vmatpush1.bf16.msra.mxu0 %v4449_v34  ;;  %v4624_v34 = vld [vmem:[#allocation2 + $0xd4] ss:$8 sps:$4 sm:$0xff]  }
  0xe0   :  { %2036 = vmatprep.subr.bf16.mxu0 %v4452_v35  ;;  %1902 = vmatpush1.bf16.msra.mxu1 %v4620_v31  ;;  %v4626_v35 = vld [vmem:[#allocation2 + $0xd0] ss:$8 sps:$4 sm:$0xff]  }
  0xe1   :  { %1903 = vmatprep.subr.bf16.mxu1 %v4624_v34  ;;  %v4696_v31 = vld [vmem:[#allocation2 + $0x190] ss:$8 sps:$4 sm:$0xff]   ;;  %v4704_v34 = vld [vmem:[#allocation2 + $0x1a4] ss:$8 sps:$4 sm:$0xff]  }
  0xe2   :  { %2016 = vmatmul.mubr.bf16.vlgmr.msra.gmra.mrb[0].mxu0 %v3886_v38  ;;  %v4497_v38 = vld [vmem:[#allocation2 + $0x3f4] ss:$8 sps:$4 sm:$0xff]  }
  0xe3   :  { %2037 = vmatpush1.bf16.msra.mxu0 %v4450_v39  ;;  %2025 = vmatprep.mubr.bf16.mxu0 %v3903_v40  ;;  %v4495_v39 = vld [vmem:[#allocation2 + $0x3f0] ss:$8 sps:$4 sm:$0xff]   ;;  %v4500_v40 = vld [vmem:[#allocation2 + $0x404] ss:$8 sps:$4 sm:$0xff]  }
  0xe4   :  { %2038 = vmatprep.subr.bf16.mxu0 %v4455_v41  ;;  %1904 = vmatpush1.bf16.msra.mxu1 %v4626_v35  ;;  %v4632_v41 = vld [vmem:[#allocation2 + $0xe0] ss:$8 sps:$4 sm:$0xff]  }
  0xe5   :  { %1905 = vmatprep.subr.bf16.mxu1 %v4630_v37  ;;  %v4702_v35 = vld [vmem:[#allocation2 + $0x1a0] ss:$8 sps:$4 sm:$0xff]   ;;  %v4536_v37 = vld [vmem:[#allocation2 + $0x4c4] ss:$8 sps:$4 sm:$0xff]  }
  0xe7   :  { %2039 = vmatpush1.bf16.msra.mxu0 %v4453_v42  ;;  %v168_v42 = vld [vmem:[%s6060_s0 + $0x98] sm:$0xff] }
  0xe8   :  { %2040 = vmatprep.subr.bf16.mxu0 %v4458_v43  ;;  %v176_v43 = vld [vmem:[%s6060_s0 + $0xd8] sm:$0xff]  ;;  %1906 = vmatpush1.bf16.msra.mxu1 %v4632_v41 }
  0xe9   :  { %1907 = vmatprep.subr.bf16.mxu1 %v4636_v44  ;;  %v3904_v61 = vcombine.low %v168_v42, %v176_v43  ;;  %v4539_v41 = vld [vmem:[#allocation2 + $0x4d4] ss:$8 sps:$4 sm:$0xff]   ;;  %v4537_v44 = vld [vmem:[#allocation2 + $0x4d0] ss:$8 sps:$4 sm:$0xff]  }
  0xea   :  { %2026 = vmatmul.mubr.bf16.gmra.mrb[4].mxu0 %v3902_v49  ;;  %v3888_v49 = vcombine.low %v5369_v46, %v5374_v47  ;;  %v5395_v46 = vld [vmem:[%s6060_s0 + $0x20] sm:$0xff] }
  0xeb   :  { %2041 = vmatpush1.bf16.msra.mxu0 %v4456_v48  ;;  %2068 = vmatprep.mubr.bf16.mxu0 %v3889_v51  ;;  %v157_v48 = vld [vmem:[%s6060_s0 + $0x40] sm:$0xff] }
  0xec   :  { %2042 = vmatprep.subr.bf16.mxu0 %v4461_v53  ;;  %v3883_v51 = vcombine.high %v149_v45, %v157_v48  ;;  %v3905_v53 = vcombine.high %v168_v42, %v176_v43  ;;  %1908 = vmatpush1.bf16.msra.mxu1 %v4638_v50  ;;  %v5400_v47 = vld [vmem:[%s6060_s0 + $0x60] sm:$0xff] }
  0xed   :  { %1930 = vmatprep.subr.bf16.mxu1 %v4644_v55  ;;  %v4716_v42 = vld [vmem:[#allocation2 + $0x1c4] ss:$8 sps:$4 sm:$0xff]   ;;  %v4714_v43 = vld [vmem:[#allocation2 + $0x1c0] ss:$8 sps:$4 sm:$0xff]  }
  0xee   :  { %1909 = vmatprep.mubr.bf16.mxu1 %v3883_v51  ;;  %v173_v50 = vld [vmem:[%s6060_s0 + $0xc0] sm:$0xff] }
  0xef   :  { %2043 = vmatpush1.bf16.msra.mxu0 %v4459_v56  ;;  %v4501_v56 = vld [vmem:[#allocation2 + $0x410] ss:$8 sps:$4 sm:$0xff]   ;;  %v4728_v55 = vld [vmem:[#allocation2 + $0x1e4] ss:$8 sps:$4 sm:$0xff]  }
  0xf0   :  { %2044 = vmatprep.subr.bf16.mxu0 %v4464_v57  ;;  %v3882_v57 = vcombine.low %v149_v45, %v157_v48  ;;  %v4542_v45 = vld [vmem:[#allocation2 + $0x4e4] ss:$8 sps:$4 sm:$0xff]   ;;  %v4722_v48 = vld [vmem:[#allocation2 + $0x1d4] ss:$8 sps:$4 sm:$0xff]  }
  0xf2   :  { %1910 = vmatmul.mubr.bf16.vlgmr.msra.gmra.mrb[0].mxu1 %v3882_v57  ;;  %v4543_v57 = vld [vmem:[#allocation2 + $0x4f0] ss:$8 sps:$4 sm:$0xff]  }
  0xf3   :  { %2045 = vmatpush1.bf16.msra.mxu0 %v4462_v59  ;;  %v4642_v59 = vld [vmem:[#allocation2 + $0x100] ss:$8 sps:$4 sm:$0xff]  }
  0xf4   :  { %2046 = vmatprep.subr.bf16.mxu0 %v4467_v62  ;;  %1931 = vmatpush1.bf16.msra.mxu1 %v4642_v59  ;;  %v4648_v62 = vld [vmem:[#allocation2 + $0x110] ss:$8 sps:$4 sm:$0xff]   ;;  %v4726_v59 = vld [vmem:[#allocation2 + $0x1e0] ss:$8 sps:$4 sm:$0xff]  }
  0xf5   :  { %1932 = vmatprep.subr.bf16.mxu1 %v4650_v60  ;;  %v169_v60 = vld [vmem:[%s6060_s0 + $0xa0] sm:$0xff] }
  0xf7   :  { %2047 = vmatpush1.bf16.msra.mxu0 %v4465_v0  ;;  %v4509_v0 = vld [vmem:[#allocation2 + $0x434] ss:$8 sps:$4 sm:$0xff]  }
  0xf8   :  { %2048 = vmatprep.subr.bf16.mxu0 %v4470_v1  ;;  %v3891_v1 = vcombine.high %v5395_v46, %v5400_v47  ;;  %1933 = vmatpush1.bf16.msra.mxu1 %v4648_v62  ;;  %v4734_v62 = vld [vmem:[#allocation2 + $0x1f4] ss:$8 sps:$4 sm:$0xff]  }
  0xf9   :  { %1934 = vmatprep.subr.bf16.mxu1 %v4656_v2 }
  0xfb   :  { %2049 = vmatpush1.bf16.msra.mxu0 %v4468_v4  ;;  %v4507_v4 = vld [vmem:[#allocation2 + $0x430] ss:$8 sps:$4 sm:$0xff]  }
  0xfc   :  { %2050 = vmatprep.subr.bf16.mxu0 %v4473_v5  ;;  %v4512_v5 = vld [vmem:[#allocation2 + $0x444] ss:$8 sps:$4 sm:$0xff]   ;;  %1935 = vmatpush1.bf16.msra.mxu1 %v4654_v3  ;;  %v3890_v3 = vcombine.low %v5395_v46, %v5400_v47 }
  0xfd   :  { %1936 = vmatprep.subr.bf16.mxu1 %v4662_v6  ;;  %v4557_v6 = vld [vmem:[#allocation2 + $0x514] ss:$8 sps:$4 sm:$0xff]   ;;  %v5432_v46 = vld [vmem:[%s6060_s0 + $0x68] sm:$0xff] }
  0xff   :  { %2051 = vmatpush1.bf16.msra.mxu0 %v4471_v8  ;;  %v4510_v8 = vld [vmem:[#allocation2 + $0x440] ss:$8 sps:$4 sm:$0xff]  }
 0x100   :  { %2052 = vmatprep.subr.bf16.mxu0 %v4476_v9  ;;  %v4515_v9 = vld [vmem:[#allocation2 + $0x454] ss:$8 sps:$4 sm:$0xff]   ;;  %1937 = vmatpush1.bf16.msra.mxu1 %v4660_v7  ;;  %v4555_v7 = vld [vmem:[#allocation2 + $0x510] ss:$8 sps:$4 sm:$0xff]  }
 0x101   :  { %1938 = vmatprep.subr.bf16.mxu1 %v4668_v10  ;;  %v5427_v10 = vld [vmem:[%s6060_s0 + $0x28] sm:$0xff] }
 0x103   :  { %2053 = vmatpush1.bf16.msra.mxu0 %v4474_v12  ;;  %v4513_v12 = vld [vmem:[#allocation2 + $0x450] ss:$8 sps:$4 sm:$0xff]  }
 0x104   :  { %2054 = vmatprep.subr.bf16.mxu0 %v4479_v13  ;;  %v4518_v13 = vld [vmem:[#allocation2 + $0x464] ss:$8 sps:$4 sm:$0xff]   ;;  %1939 = vmatpush1.bf16.msra.mxu1 %v4666_v11  ;;  %v4561_v11 = vld [vmem:[#allocation2 + $0x520] ss:$8 sps:$4 sm:$0xff]  }
 0x105   :  { %1940 = vmatprep.subr.bf16.mxu1 %v4674_v14  ;;  %v4567_v14 = vld [vmem:[#allocation2 + $0x530] ss:$8 sps:$4 sm:$0xff]  }
 0x107   :  { %2055 = vmatpush1.bf16.msra.mxu0 %v4477_v16  ;;  %v4516_v16 = vld [vmem:[#allocation2 + $0x460] ss:$8 sps:$4 sm:$0xff]  }
 0x108   :  { %2056 = vmatprep.subr.bf16.mxu0 %v4482_v17  ;;  %v4521_v17 = vld [vmem:[#allocation2 + $0x474] ss:$8 sps:$4 sm:$0xff]   ;;  %1941 = vmatpush1.bf16.msra.mxu1 %v4672_v15  ;;  %v4575_v15 = vld [vmem:[#allocation2 + $0x544] ss:$8 sps:$4 sm:$0xff]  }
 0x109   :  { %1942 = vmatprep.subr.bf16.mxu1 %v4680_v18  ;;  %v4579_v18 = vld [vmem:[#allocation2 + $0x550] ss:$8 sps:$4 sm:$0xff]  }
 0x10b   :  { %2057 = vmatpush1.bf16.msra.mxu0 %v4480_v20  ;;  %v4519_v20 = vld [vmem:[#allocation2 + $0x470] ss:$8 sps:$4 sm:$0xff]  }
 0x10c   :  { %2058 = vmatprep.subr.bf16.mxu0 %v4485_v21  ;;  %v4524_v21 = vld [vmem:[#allocation2 + $0x484] ss:$8 sps:$4 sm:$0xff]   ;;  %1943 = vmatpush1.bf16.msra.mxu1 %v4678_v19 }
 0x10d   :  { %1944 = vmatprep.subr.bf16.mxu1 %v4686_v22  ;;  %v4587_v19 = vld [vmem:[#allocation2 + $0x564] ss:$8 sps:$4 sm:$0xff]   ;;  %v4591_v22 = vld [vmem:[#allocation2 + $0x570] ss:$8 sps:$4 sm:$0xff]  }
 0x10f   :  { %2059 = vmatpush1.bf16.msra.mxu0 %v4483_v24  ;;  %v4522_v24 = vld [vmem:[#allocation2 + $0x480] ss:$8 sps:$4 sm:$0xff]  }
 0x110   :  { %2060 = vmatprep.subr.bf16.mxu0 %v4488_v25  ;;  %v4527_v25 = vld [vmem:[#allocation2 + $0x494] ss:$8 sps:$4 sm:$0xff]   ;;  %1945 = vmatpush1.bf16.msra.mxu1 %v4684_v23  ;;  %v4599_v23 = vld [vmem:[#allocation2 + $0x584] ss:$8 sps:$4 sm:$0xff]  }
 0x111   :  { %1946 = vmatprep.subr.bf16.mxu1 %v4692_v26  ;;  %v4603_v26 = vld [vmem:[#allocation2 + $0x590] ss:$8 sps:$4 sm:$0xff]  }
 0x113   :  { %2061 = vmatpush1.bf16.msra.mxu0 %v4486_v28  ;;  %v4525_v28 = vld [vmem:[#allocation2 + $0x490] ss:$8 sps:$4 sm:$0xff]  }
 0x114   :  { %2062 = vmatprep.subr.bf16.mxu0 %v4491_v29  ;;  %v4530_v29 = vld [vmem:[#allocation2 + $0x4a4] ss:$8 sps:$4 sm:$0xff]   ;;  %1947 = vmatpush1.bf16.msra.mxu1 %v4690_v27 }
 0x115   :  { %1948 = vmatprep.subr.bf16.mxu1 %v4698_v30  ;;  %v4611_v27 = vld [vmem:[#allocation2 + $0x5a4] ss:$8 sps:$4 sm:$0xff]   ;;  %v4615_v30 = vld [vmem:[#allocation2 + $0x5b0] ss:$8 sps:$4 sm:$0xff]  }
 0x117   :  { %2063 = vmatpush1.bf16.msra.mxu0 %v4489_v32  ;;  %v4528_v32 = vld [vmem:[#allocation2 + $0x4a0] ss:$8 sps:$4 sm:$0xff]  }
 0x118   :  { %2064 = vmatprep.subr.bf16.mxu0 %v4494_v33  ;;  %v4533_v33 = vld [vmem:[#allocation2 + $0x4b4] ss:$8 sps:$4 sm:$0xff]   ;;  %1949 = vmatpush1.bf16.msra.mxu1 %v4696_v31  ;;  %v4623_v31 = vld [vmem:[#allocation2 + $0x5c4] ss:$8 sps:$4 sm:$0xff]  }
 0x119   :  { %1950 = vmatprep.subr.bf16.mxu1 %v4704_v34  ;;  %v4627_v34 = vld [vmem:[#allocation2 + $0x5d0] ss:$8 sps:$4 sm:$0xff]  }
 0x11b   :  { %2065 = vmatpush1.bf16.msra.mxu0 %v4492_v36  ;;  %v4531_v36 = vld [vmem:[#allocation2 + $0x4b0] ss:$8 sps:$4 sm:$0xff]  }
 0x11c   :  { %2066 = vmatprep.subr.bf16.mxu0 %v4497_v38  ;;  %v4710_v38 = vld [vmem:[#allocation2 + $0x1b4] ss:$8 sps:$4 sm:$0xff]   ;;  %1951 = vmatpush1.bf16.msra.mxu1 %v4702_v35  ;;  %v166_v35 = vld [vmem:[%s6060_s0 + $0x88] sm:$0xff] }
 0x11d   :  { %1952 = vmatprep.subr.bf16.mxu1 %v4710_v38 }
 0x11f   :  { %2067 = vmatpush1.bf16.msra.mxu0 %v4495_v39  ;;  %v4708_v39 = vld [vmem:[#allocation2 + $0x1b0] ss:$8 sps:$4 sm:$0xff]  }
 0x120   :  { %2089 = vmatprep.subr.bf16.mxu0 %v4500_v40  ;;  %v4534_v40 = vld [vmem:[#allocation2 + $0x4c0] ss:$8 sps:$4 sm:$0xff]   ;;  %1953 = vmatpush1.bf16.msra.mxu1 %v4708_v39 }
 0x121   :  { %1954 = vmatprep.subr.bf16.mxu1 %v4716_v42  ;;  %v4639_v42 = vld [vmem:[#allocation2 + $0x5f0] ss:$8 sps:$4 sm:$0xff]  }
 0x122   :  { %2069 = vmatmul.mubr.bf16.vlgmr.msra.gmra.mrb[0].mxu0 %v3888_v49  ;;  %v165_v49 = vld [vmem:[%s6060_s0 + $0x80] sm:$0xff] }
 0x123   :  { %2090 = vmatpush1.bf16.msra.mxu0 %v4498_v52  ;;  %2078 = vmatprep.mubr.bf16.mxu0 %v3905_v53  ;;  %v3899_v51 = vcombine.high %v165_v49, %v173_v50  ;;  %v4720_v52 = vld [vmem:[#allocation2 + $0x1d0] ss:$8 sps:$4 sm:$0xff]   ;;  %v3898_v53 = vcombine.low %v165_v49, %v173_v50  ;;  %v4645_v49 = vld [vmem:[#allocation2 + $0x600] ss:$8 sps:$4 sm:$0xff]  }
 0x124   :  { %2091 = vmatprep.subr.bf16.mxu0 %v4503_v54  ;;  %1955 = vmatpush1.bf16.msra.mxu1 %v4714_v43  ;;  %v4540_v54 = vld [vmem:[#allocation2 + $0x4e0] ss:$8 sps:$4 sm:$0xff]   ;;  %v4647_v43 = vld [vmem:[#allocation2 + $0x604] ss:$8 sps:$4 sm:$0xff]  }
 0x125   :  { %1956 = vmatprep.subr.bf16.mxu1 %v4722_v48  ;;  %1919 = vmatprep.mubr.bf16.mxu1 %v3899_v51  ;;  %v3892_v48 = vcombine.low %v5427_v10, %v5432_v46  ;;  %v4653_v51 = vld [vmem:[#allocation2 + $0x614] ss:$8 sps:$4 sm:$0xff]  }
 0x126   :  { %1920 = vmatmul.mubr.bf16.gmra.mrb[4].mxu1 %v3898_v53  ;;  %v4659_v53 = vld [vmem:[#allocation2 + $0x624] ss:$8 sps:$4 sm:$0xff]  }
 0x127   :  { %2092 = vmatpush1.bf16.msra.mxu0 %v4501_v56  ;;  %v4545_v56 = vld [vmem:[#allocation2 + $0x4f4] ss:$8 sps:$4 sm:$0xff]  }
 0x128   :  { %2093 = vmatprep.subr.bf16.mxu0 %v4506_v58  ;;  %v4551_v58 = vld [vmem:[#allocation2 + $0x504] ss:$8 sps:$4 sm:$0xff]   ;;  %1957 = vmatpush1.bf16.msra.mxu1 %v4720_v52  ;;  %v4651_v52 = vld [vmem:[#allocation2 + $0x610] ss:$8 sps:$4 sm:$0xff]  }
 0x129   :  { %1958 = vmatprep.subr.bf16.mxu1 %v4728_v55  ;;  %v5458_v55 = vld [vmem:[%s6060_s0 + $0x70] sm:$0xff] }
 0x12a   :  { %2079 = vmatmul.mubr.bf16.gmra.mrb[4].mxu0 %v3904_v61  ;;  %v177_v61 = vld [vmem:[%s6060_s0 + $0xe0] sm:$0xff] }
 0x12b   :  { %2094 = vmatpush1.bf16.msra.mxu0 %v4504_v63  ;;  %2121 = vmatprep.mubr.bf16.mxu0 %v3891_v1  ;;  %v4732_v63 = vld [vmem:[#allocation2 + $0x1f0] ss:$8 sps:$4 sm:$0xff]   ;;  %v158_v1 = vld [vmem:[%s6060_s0 + $0x48] sm:$0xff]  ;;  %v3906_v47 = vcombine.low %v169_v60, %v177_v61 }
 0x12c   :  { %2095 = vmatprep.subr.bf16.mxu0 %v4509_v0  ;;  %v150_v0 = vld [vmem:[%s6060_s0 + $0x8] sm:$0xff]  ;;  %1959 = vmatpush1.bf16.msra.mxu1 %v4726_v59  ;;  %v4665_v59 = vld [vmem:[#allocation2 + $0x634] ss:$8 sps:$4 sm:$0xff]  }
 0x12d   :  { %v3885_v2 = vcombine.high %v150_v0, %v158_v1  ;;  %1960 = vmatprep.subr.bf16.mxu1 %v4734_v62  ;;  %v4669_v62 = vld [vmem:[#allocation2 + $0x640] ss:$8 sps:$4 sm:$0xff]  }
 0x12f   :  { %2096 = vmatpush1.bf16.msra.mxu0 %v4507_v4  ;;  %v4549_v4 = vld [vmem:[#allocation2 + $0x500] ss:$8 sps:$4 sm:$0xff]   ;;  %1962 = vmatprep.mubr.bf16.mxu1 %v3885_v2 }
 0x130   :  { %2097 = vmatprep.subr.bf16.mxu0 %v4512_v5  ;;  %v3907_v5 = vcombine.high %v169_v60, %v177_v61  ;;  %1961 = vmatpush1.bf16.msra.mxu1 %v4732_v63  ;;  %v4663_v60 = vld [vmem:[#allocation2 + $0x630] ss:$8 sps:$4 sm:$0xff]   ;;  %v4671_v61 = vld [vmem:[#allocation2 + $0x644] ss:$8 sps:$4 sm:$0xff]   ;;  %v4677_v63 = vld [vmem:[#allocation2 + $0x654] ss:$8 sps:$4 sm:$0xff]  }
 0x131   :  { %v4681_v2 = vld [vmem:[#allocation2 + $0x660] ss:$8 sps:$4 sm:$0xff]  }
 0x133   :  { %2098 = vmatpush1.bf16.msra.mxu0 %v4510_v8  ;;  %v3884_v8 = vcombine.low %v150_v0, %v158_v1  ;;  %v4675_v0 = vld [vmem:[#allocation2 + $0x650] ss:$8 sps:$4 sm:$0xff]   ;;  %v4683_v1 = vld [vmem:[#allocation2 + $0x664] ss:$8 sps:$4 sm:$0xff]  }
 0x134   :  { %2099 = vmatprep.subr.bf16.mxu0 %v4515_v9  ;;  %v4563_v9 = vld [vmem:[#allocation2 + $0x524] ss:$8 sps:$4 sm:$0xff]  }
 0x135   :  { %1963 = vmatmul.mubr.bf16.vlgmr.msra.gmra.mrb[0].mxu1 %v3884_v8  ;;  %v4699_v8 = vld [vmem:[#allocation2 + $0x690] ss:$8 sps:$4 sm:$0xff]  }
 0x137   :  { %2100 = vmatpush1.bf16.msra.mxu0 %v4513_v12  ;;  %v4569_v12 = vld [vmem:[#allocation2 + $0x534] ss:$8 sps:$4 sm:$0xff]  }
 0x138   :  { %2101 = vmatprep.subr.bf16.mxu0 %v4518_v13  ;;  %v3893_v13 = vcombine.high %v5427_v10, %v5432_v46  ;;  %v4705_v10 = vld [vmem:[#allocation2 + $0x6a0] ss:$8 sps:$4 sm:$0xff]   ;;  %v4713_v46 = vld [vmem:[#allocation2 + $0x6b4] ss:$8 sps:$4 sm:$0xff]  }
 0x13b   :  { %2102 = vmatpush1.bf16.msra.mxu0 %v4516_v16  ;;  %v4573_v16 = vld [vmem:[#allocation2 + $0x540] ss:$8 sps:$4 sm:$0xff]  }
 0x13c   :  { %2103 = vmatprep.subr.bf16.mxu0 %v4521_v17  ;;  %v4581_v17 = vld [vmem:[#allocation2 + $0x554] ss:$8 sps:$4 sm:$0xff]  }
 0x13f   :  { %2104 = vmatpush1.bf16.msra.mxu0 %v4519_v20  ;;  %v4585_v20 = vld [vmem:[#allocation2 + $0x560] ss:$8 sps:$4 sm:$0xff]  }
 0x140   :  { %2105 = vmatprep.subr.bf16.mxu0 %v4524_v21  ;;  %v4593_v21 = vld [vmem:[#allocation2 + $0x574] ss:$8 sps:$4 sm:$0xff]  }
 0x143   :  { %2106 = vmatpush1.bf16.msra.mxu0 %v4522_v24  ;;  %v4597_v24 = vld [vmem:[#allocation2 + $0x580] ss:$8 sps:$4 sm:$0xff]  }
 0x144   :  { %2107 = vmatprep.subr.bf16.mxu0 %v4527_v25  ;;  %v4605_v25 = vld [vmem:[#allocation2 + $0x594] ss:$8 sps:$4 sm:$0xff]  }
 0x147   :  { %2108 = vmatpush1.bf16.msra.mxu0 %v4525_v28  ;;  %v4609_v28 = vld [vmem:[#allocation2 + $0x5a0] ss:$8 sps:$4 sm:$0xff]  }
 0x148   :  { %2109 = vmatprep.subr.bf16.mxu0 %v4530_v29  ;;  %v4617_v29 = vld [vmem:[#allocation2 + $0x5b4] ss:$8 sps:$4 sm:$0xff]  }
 0x14b   :  { %2110 = vmatpush1.bf16.msra.mxu0 %v4528_v32  ;;  %v4621_v32 = vld [vmem:[#allocation2 + $0x5c0] ss:$8 sps:$4 sm:$0xff]  }
 0x14c   :  { %2111 = vmatprep.subr.bf16.mxu0 %v4533_v33  ;;  %v4629_v33 = vld [vmem:[#allocation2 + $0x5d4] ss:$8 sps:$4 sm:$0xff]  }
 0x14f   :  { %2112 = vmatpush1.bf16.msra.mxu0 %v4531_v36  ;;  %v174_v36 = vld [vmem:[%s6060_s0 + $0xc8] sm:$0xff] }
 0x150   :  { %2113 = vmatprep.subr.bf16.mxu0 %v4536_v37  ;;  %v4635_v37 = vld [vmem:[#allocation2 + $0x5e4] ss:$8 sps:$4 sm:$0xff]   ;;  %v3901_v38 = vcombine.high %v166_v35, %v174_v36  ;;  %v3900_v39 = vcombine.low %v166_v35, %v174_v36  ;;  %v4750_v36 = vld [vmem:[#allocation2 + $0x740] ss:$8 sps:$4 sm:$0xff]  }
 0x151   :  { %v4752_v35 = vld [vmem:[#allocation2 + $0x744] ss:$8 sps:$4 sm:$0xff]  }
 0x152   :  { %1972 = vmatprep.mubr.bf16.mxu1 %v3901_v38  ;;  %v4753_v38 = vld [vmem:[#allocation2 + $0x750] ss:$8 sps:$4 sm:$0xff]  }
 0x153   :  { %2114 = vmatpush1.bf16.msra.mxu0 %v4534_v40  ;;  %v4633_v40 = vld [vmem:[#allocation2 + $0x5e0] ss:$8 sps:$4 sm:$0xff]   ;;  %1973 = vmatmul.mubr.bf16.gmra.mrb[4].mxu1 %v3900_v39  ;;  %v4758_v39 = vld [vmem:[#allocation2 + $0x764] ss:$8 sps:$4 sm:$0xff]  }
 0x154   :  { %2115 = vmatprep.subr.bf16.mxu0 %v4539_v41  ;;  %v4641_v41 = vld [vmem:[#allocation2 + $0x5f4] ss:$8 sps:$4 sm:$0xff]  }
 0x157   :  { %2116 = vmatpush1.bf16.msra.mxu0 %v4537_v44  ;;  %v170_v44 = vld [vmem:[%s6060_s0 + $0xa8] sm:$0xff] }
 0x158   :  { %2117 = vmatprep.subr.bf16.mxu0 %v4542_v45  ;;  %v178_v45 = vld [vmem:[%s6060_s0 + $0xe8] sm:$0xff] }
 0x159   :  { %v3909_v50 = vcombine.high %v170_v44, %v178_v45 }
 0x15b   :  { %2118 = vmatpush1.bf16.msra.mxu0 %v4540_v54  ;;  %v5453_v54 = vld [vmem:[%s6060_s0 + $0x30] sm:$0xff] }
 0x15c   :  { %2119 = vmatprep.subr.bf16.mxu0 %v4545_v56  ;;  %v3908_v56 = vcombine.low %v170_v44, %v178_v45  ;;  %v4762_v44 = vld [vmem:[#allocation2 + $0x780] ss:$8 sps:$4 sm:$0xff]   ;;  %v4767_v45 = vld [vmem:[#allocation2 + $0x794] ss:$8 sps:$4 sm:$0xff]  }
 0x15f   :  { %2120 = vmatpush1.bf16.msra.mxu0 %v4543_v57  ;;  %v4657_v57 = vld [vmem:[#allocation2 + $0x620] ss:$8 sps:$4 sm:$0xff]  }
 0x160   :  { %2142 = vmatprep.subr.bf16.mxu0 %v4551_v58  ;;  %v3895_v58 = vcombine.high %v5453_v54, %v5458_v55 }
 0x162   :  { %2122 = vmatmul.mubr.bf16.vlgmr.msra.gmra.mrb[0].mxu0 %v3890_v3  ;;  %v4689_v3 = vld [vmem:[#allocation2 + $0x674] ss:$8 sps:$4 sm:$0xff]  }
 0x163   :  { %2143 = vmatpush1.bf16.msra.mxu0 %v4549_v4  ;;  %2131 = vmatprep.mubr.bf16.mxu0 %v3907_v5  ;;  %v4687_v4 = vld [vmem:[#allocation2 + $0x670] ss:$8 sps:$4 sm:$0xff]   ;;  %v4695_v5 = vld [vmem:[#allocation2 + $0x684] ss:$8 sps:$4 sm:$0xff]  }
 0x164   :  { %2144 = vmatprep.subr.bf16.mxu0 %v4557_v6  ;;  %v4693_v6 = vld [vmem:[#allocation2 + $0x680] ss:$8 sps:$4 sm:$0xff]  }
 0x167   :  { %2145 = vmatpush1.bf16.msra.mxu0 %v4555_v7  ;;  %v4701_v7 = vld [vmem:[#allocation2 + $0x694] ss:$8 sps:$4 sm:$0xff]  }
 0x168   :  { %2146 = vmatprep.subr.bf16.mxu0 %v4563_v9  ;;  %v4707_v9 = vld [vmem:[#allocation2 + $0x6a4] ss:$8 sps:$4 sm:$0xff]  }
 0x16a   :  { %2132 = vmatmul.mubr.bf16.gmra.mrb[4].mxu0 %v3906_v47  ;;  %v4711_v47 = vld [vmem:[#allocation2 + $0x6b0] ss:$8 sps:$4 sm:$0xff]  }
 0x16b   :  { %2147 = vmatpush1.bf16.msra.mxu0 %v4561_v11  ;;  %2174 = vmatprep.mubr.bf16.mxu0 %v3893_v13  ;;  %v4719_v11 = vld [vmem:[#allocation2 + $0x6c4] ss:$8 sps:$4 sm:$0xff]   ;;  %v4725_v13 = vld [vmem:[#allocation2 + $0x6d4] ss:$8 sps:$4 sm:$0xff]  }
 0x16c   :  { %2148 = vmatprep.subr.bf16.mxu0 %v4569_v12  ;;  %v4717_v12 = vld [vmem:[#allocation2 + $0x6c0] ss:$8 sps:$4 sm:$0xff]  }
 0x16f   :  { %2149 = vmatpush1.bf16.msra.mxu0 %v4567_v14  ;;  %v4723_v14 = vld [vmem:[#allocation2 + $0x6d0] ss:$8 sps:$4 sm:$0xff]  }
 0x170   :  { %2150 = vmatprep.subr.bf16.mxu0 %v4575_v15  ;;  %v4731_v15 = vld [vmem:[#allocation2 + $0x6e4] ss:$8 sps:$4 sm:$0xff]  }
 0x173   :  { %2151 = vmatpush1.bf16.msra.mxu0 %v4573_v16  ;;  %v4729_v16 = vld [vmem:[#allocation2 + $0x6e0] ss:$8 sps:$4 sm:$0xff]  }
 0x174   :  { %2152 = vmatprep.subr.bf16.mxu0 %v4581_v17  ;;  %v4737_v17 = vld [vmem:[#allocation2 + $0x6f4] ss:$8 sps:$4 sm:$0xff]  }
 0x177   :  { %2153 = vmatpush1.bf16.msra.mxu0 %v4579_v18  ;;  %v4735_v18 = vld [vmem:[#allocation2 + $0x6f0] ss:$8 sps:$4 sm:$0xff]  }
 0x178   :  { %2154 = vmatprep.subr.bf16.mxu0 %v4587_v19  ;;  %v4740_v19 = vld [vmem:[#allocation2 + $0x704] ss:$8 sps:$4 sm:$0xff]  }
 0x17b   :  { %2155 = vmatpush1.bf16.msra.mxu0 %v4585_v20  ;;  %v171_v20 = vld [vmem:[%s6060_s0 + $0xb0] sm:$0xff] }
 0x17c   :  { %2156 = vmatprep.subr.bf16.mxu0 %v4593_v21  ;;  %v179_v21 = vld [vmem:[%s6060_s0 + $0xf0] sm:$0xff] }
 0x17f   :  { %2157 = vmatpush1.bf16.msra.mxu0 %v4591_v22  ;;  %v3894_v22 = vcombine.low %v5453_v54, %v5458_v55  ;;  %v4774_v54 = vld [vmem:[#allocation2 + $0x7c0] ss:$8 sps:$4 sm:$0xff]   ;;  %v4779_v55 = vld [vmem:[#allocation2 + $0x7d4] ss:$8 sps:$4 sm:$0xff]  }
 0x180   :  { %2158 = vmatprep.subr.bf16.mxu0 %v4599_v23  ;;  %v4738_v23 = vld [vmem:[#allocation2 + $0x700] ss:$8 sps:$4 sm:$0xff]  }
 0x183   :  { %2159 = vmatpush1.bf16.msra.mxu0 %v4597_v24  ;;  %v3911_v24 = vcombine.high %v171_v20, %v179_v21 }
 0x184   :  { %2160 = vmatprep.subr.bf16.mxu0 %v4605_v25  ;;  %v4743_v25 = vld [vmem:[#allocation2 + $0x714] ss:$8 sps:$4 sm:$0xff]  }
 0x187   :  { %2161 = vmatpush1.bf16.msra.mxu0 %v4603_v26  ;;  %v4741_v26 = vld [vmem:[#allocation2 + $0x710] ss:$8 sps:$4 sm:$0xff]  }
 0x188   :  { %2162 = vmatprep.subr.bf16.mxu0 %v4611_v27  ;;  %v4746_v27 = vld [vmem:[#allocation2 + $0x724] ss:$8 sps:$4 sm:$0xff]  }
 0x18b   :  { %2163 = vmatpush1.bf16.msra.mxu0 %v4609_v28  ;;  %v5473_v28 = vld [vmem:[%s6060_s0 + $0x38] sm:$0xff] }
 0x18c   :  { %2164 = vmatprep.subr.bf16.mxu0 %v4617_v29  ;;  %v5478_v29 = vld [vmem:[%s6060_s0 + $0x78] sm:$0xff] }
 0x18f   :  { %2165 = vmatpush1.bf16.msra.mxu0 %v4615_v30  ;;  %v3910_v30 = vcombine.low %v171_v20, %v179_v21  ;;  %v4806_v20 = vld [vmem:[#allocation4 + $0xc4] ss:$16 sps:$4 sm:$0xff]   ;;  %v4804_v21 = vld [vmem:[#allocation4 + $0xc0] ss:$16 sps:$4 sm:$0xff]  }
 0x190   :  { %2166 = vmatprep.subr.bf16.mxu0 %v4623_v31  ;;  %v4744_v31 = vld [vmem:[#allocation2 + $0x720] ss:$8 sps:$4 sm:$0xff]  }
 0x193   :  { %2167 = vmatpush1.bf16.msra.mxu0 %v4621_v32  ;;  %v3897_v32 = vcombine.high %v5473_v28, %v5478_v29 }
 0x194   :  { %2168 = vmatprep.subr.bf16.mxu0 %v4629_v33  ;;  %v4749_v33 = vld [vmem:[#allocation2 + $0x734] ss:$8 sps:$4 sm:$0xff]  }
 0x197   :  { %2169 = vmatpush1.bf16.msra.mxu0 %v4627_v34  ;;  %v4747_v34 = vld [vmem:[#allocation2 + $0x730] ss:$8 sps:$4 sm:$0xff]  }
 0x198   :  { %2170 = vmatprep.subr.bf16.mxu0 %v4635_v37  ;;  %v4755_v37 = vld [vmem:[#allocation2 + $0x754] ss:$8 sps:$4 sm:$0xff]  }
 0x19b   :  { %2171 = vmatpush1.bf16.msra.mxu0 %v4633_v40  ;;  %v4756_v40 = vld [vmem:[#allocation2 + $0x760] ss:$8 sps:$4 sm:$0xff]  }
 0x19c   :  { %2172 = vmatprep.subr.bf16.mxu0 %v4641_v41  ;;  %v4761_v41 = vld [vmem:[#allocation2 + $0x774] ss:$8 sps:$4 sm:$0xff]  }
 0x19f   :  { %2173 = vmatpush1.bf16.msra.mxu0 %v4639_v42  ;;  %v4759_v42 = vld [vmem:[#allocation2 + $0x770] ss:$8 sps:$4 sm:$0xff]  }
 0x1a0   :  { %2195 = vmatprep.subr.bf16.mxu0 %v4647_v43  ;;  %v4764_v43 = vld [vmem:[#allocation2 + $0x784] ss:$8 sps:$4 sm:$0xff]  }
 0x1a2   :  { %2175 = vmatmul.mubr.bf16.vlgmr.msra.gmra.mrb[0].mxu0 %v3892_v48  ;;  %v4765_v48 = vld [vmem:[#allocation2 + $0x790] ss:$8 sps:$4 sm:$0xff]  }
 0x1a3   :  { %2196 = vmatpush1.bf16.msra.mxu0 %v4645_v49  ;;  %2184 = vmatprep.mubr.bf16.mxu0 %v3909_v50  ;;  %v4770_v49 = vld [vmem:[#allocation2 + $0x7a4] ss:$8 sps:$4 sm:$0xff]   ;;  %v4768_v50 = vld [vmem:[#allocation2 + $0x7a0] ss:$8 sps:$4 sm:$0xff]  }
 0x1a4   :  { %2197 = vmatprep.subr.bf16.mxu0 %v4653_v51  ;;  %v4773_v51 = vld [vmem:[#allocation2 + $0x7b4] ss:$8 sps:$4 sm:$0xff]  }
 0x1a7   :  { %2198 = vmatpush1.bf16.msra.mxu0 %v4651_v52  ;;  %v4771_v52 = vld [vmem:[#allocation2 + $0x7b0] ss:$8 sps:$4 sm:$0xff]  }
 0x1a8   :  { %2199 = vmatprep.subr.bf16.mxu0 %v4659_v53  ;;  %v4776_v53 = vld [vmem:[#allocation2 + $0x7c4] ss:$8 sps:$4 sm:$0xff]  }
 0x1aa   :  { %2185 = vmatmul.mubr.bf16.gmra.mrb[4].mxu0 %v3908_v56  ;;  %v4777_v56 = vld [vmem:[#allocation2 + $0x7d0] ss:$8 sps:$4 sm:$0xff]  }
 0x1ab   :  { %2200 = vmatpush1.bf16.msra.mxu0 %v4657_v57  ;;  %2227 = vmatprep.mubr.bf16.mxu0 %v3895_v58  ;;  %v4782_v57 = vld [vmem:[#allocation2 + $0x7e4] ss:$8 sps:$4 sm:$0xff]   ;;  %v4780_v58 = vld [vmem:[#allocation2 + $0x7e0] ss:$8 sps:$4 sm:$0xff]  }
 0x1ac   :  { %2201 = vmatprep.subr.bf16.mxu0 %v4665_v59  ;;  %v4785_v59 = vld [vmem:[#allocation2 + $0x7f4] ss:$8 sps:$4 sm:$0xff]  }
 0x1af   :  { %2202 = vmatpush1.bf16.msra.mxu0 %v4663_v60  ;;  %v4783_v60 = vld [vmem:[#allocation2 + $0x7f0] ss:$8 sps:$4 sm:$0xff]  }
 0x1b0   :  { %2203 = vmatprep.subr.bf16.mxu0 %v4671_v61  ;;  %v172_v61 = vld [vmem:[%s6060_s0 + $0xb8] sm:$0xff] }
 0x1b3   :  { %2204 = vmatpush1.bf16.msra.mxu0 %v4669_v62  ;;  %v180_v62 = vld [vmem:[%s6060_s0 + $0xf8] sm:$0xff] }
 0x1b4   :  { %2205 = vmatprep.subr.bf16.mxu0 %v4677_v63  ;;  %v3896_v63 = vcombine.low %v5473_v28, %v5478_v29  ;;  %v4818_v28 = vld [vmem:[#allocation4 + $0x144] ss:$16 sps:$4 sm:$0xff]   ;;  %v4816_v29 = vld [vmem:[#allocation4 + $0x140] ss:$16 sps:$4 sm:$0xff]  }
 0x1b7   :  { %2206 = vmatpush1.bf16.msra.mxu0 %v4675_v0  ;;  %v3913_v0 = vcombine.high %v172_v61, %v180_v62 }
 0x1b8   :  { %2207 = vmatprep.subr.bf16.mxu0 %v4683_v1  ;;  %v3912_v1 = vcombine.low %v172_v61, %v180_v62 }
 0x1bb   :  { %2208 = vmatpush1.bf16.msra.mxu0 %v4681_v2 }
 0x1bc   :  { %2209 = vmatprep.subr.bf16.mxu0 %v4689_v3 }
 0x1bf   :  { %2210 = vmatpush1.bf16.msra.mxu0 %v4687_v4 }
 0x1c0   :  { %2211 = vmatprep.subr.bf16.mxu0 %v4695_v5 }
 0x1c3   :  { %2212 = vmatpush1.bf16.msra.mxu0 %v4693_v6 }
 0x1c4   :  { %2213 = vmatprep.subr.bf16.mxu0 %v4701_v7 }
 0x1c7   :  { %2214 = vmatpush1.bf16.msra.mxu0 %v4699_v8 }
 0x1c8   :  { %2215 = vmatprep.subr.bf16.mxu0 %v4707_v9 }
 0x1cb   :  { %2216 = vmatpush1.bf16.msra.mxu0 %v4705_v10  ;;  %v4788_v10 = vld [vmem:[#allocation4 + $0x4] ss:$16 sps:$4 sm:$0xff]  }
 0x1cc   :  { %2217 = vmatprep.subr.bf16.mxu0 %v4713_v46  ;;  %v4786_v46 = vld [vmem:[#allocation4] ss:$16 sps:$4 sm:$0xff]   ;;  %2833 = vmatprep.subr.bf16.mxu1 %v4788_v10 }
 0x1cd   :  { %2834 = vmatpush1.bf16.msra.mxu1 %v4786_v46 }
 0x1cf   :  { %2218 = vmatpush1.bf16.msra.mxu0 %v4711_v47  ;;  %v4791_v47 = vld [vmem:[#allocation4 + $0x24] ss:$16 sps:$4 sm:$0xff]  }
 0x1d0   :  { %2219 = vmatprep.subr.bf16.mxu0 %v4719_v11  ;;  %v4789_v11 = vld [vmem:[#allocation4 + $0x20] ss:$16 sps:$4 sm:$0xff]   ;;  %2835 = vmatprep.subr.bf16.mxu1 %v4791_v47 }
 0x1d1   :  { %2836 = vmatpush1.bf16.msra.mxu1 %v4789_v11 }
 0x1d3   :  { %2220 = vmatpush1.bf16.msra.mxu0 %v4717_v12  ;;  %v4794_v12 = vld [vmem:[#allocation4 + $0x44] ss:$16 sps:$4 sm:$0xff]  }
 0x1d4   :  { %2221 = vmatprep.subr.bf16.mxu0 %v4725_v13  ;;  %v4792_v13 = vld [vmem:[#allocation4 + $0x40] ss:$16 sps:$4 sm:$0xff]   ;;  %2837 = vmatprep.subr.bf16.mxu1 %v4794_v12 }
 0x1d5   :  { %2838 = vmatpush1.bf16.msra.mxu1 %v4792_v13 }
 0x1d7   :  { %2222 = vmatpush1.bf16.msra.mxu0 %v4723_v14  ;;  %v4797_v14 = vld [vmem:[#allocation4 + $0x64] ss:$16 sps:$4 sm:$0xff]  }
 0x1d8   :  { %2223 = vmatprep.subr.bf16.mxu0 %v4731_v15  ;;  %v4795_v15 = vld [vmem:[#allocation4 + $0x60] ss:$16 sps:$4 sm:$0xff]   ;;  %2839 = vmatprep.subr.bf16.mxu1 %v4797_v14 }
 0x1d9   :  { %2840 = vmatpush1.bf16.msra.mxu1 %v4795_v15 }
 0x1db   :  { %2224 = vmatpush1.bf16.msra.mxu0 %v4729_v16  ;;  %v4800_v16 = vld [vmem:[#allocation4 + $0x84] ss:$16 sps:$4 sm:$0xff]  }
 0x1dc   :  { %2225 = vmatprep.subr.bf16.mxu0 %v4737_v17  ;;  %v4798_v17 = vld [vmem:[#allocation4 + $0x80] ss:$16 sps:$4 sm:$0xff]   ;;  %2841 = vmatprep.subr.bf16.mxu1 %v4800_v16 }
 0x1dd   :  { %2842 = vmatpush1.bf16.msra.mxu1 %v4798_v17 }
 0x1df   :  { %2226 = vmatpush1.bf16.msra.mxu0 %v4735_v18  ;;  %v4803_v18 = vld [vmem:[#allocation4 + $0xa4] ss:$16 sps:$4 sm:$0xff]  }
 0x1e0   :  { %2248 = vmatprep.subr.bf16.mxu0 %v4740_v19  ;;  %v4801_v19 = vld [vmem:[#allocation4 + $0xa0] ss:$16 sps:$4 sm:$0xff]   ;;  %2843 = vmatprep.subr.bf16.mxu1 %v4803_v18 }
 0x1e1   :  { %2844 = vmatpush1.bf16.msra.mxu1 %v4801_v19 }
 0x1e2   :  { %2228 = vmatmul.mubr.bf16.vlgmr.msra.gmra.mrb[0].mxu0 %v3894_v22  ;;  %2845 = vmatprep.subr.bf16.mxu1 %v4806_v20  ;;  %v4809_v22 = vld [vmem:[#allocation4 + $0xe4] ss:$16 sps:$4 sm:$0xff]  }
 0x1e3   :  { %2249 = vmatpush1.bf16.msra.mxu0 %v4738_v23  ;;  %2237 = vmatprep.mubr.bf16.mxu0 %v3911_v24  ;;  %v4807_v23 = vld [vmem:[#allocation4 + $0xe0] ss:$16 sps:$4 sm:$0xff]   ;;  %v4812_v24 = vld [vmem:[#allocation4 + $0x104] ss:$16 sps:$4 sm:$0xff]  }
 0x1e4   :  { %2250 = vmatprep.subr.bf16.mxu0 %v4743_v25  ;;  %v4810_v25 = vld [vmem:[#allocation4 + $0x100] ss:$16 sps:$4 sm:$0xff]  }
 0x1e5   :  { %2846 = vmatpush1.bf16.msra.mxu1 %v4804_v21 }
 0x1e6   :  { %2847 = vmatprep.subr.bf16.mxu1 %v4809_v22 }
 0x1e7   :  { %2251 = vmatpush1.bf16.msra.mxu0 %v4741_v26  ;;  %v4815_v26 = vld [vmem:[#allocation4 + $0x124] ss:$16 sps:$4 sm:$0xff]  }
 0x1e8   :  { %2252 = vmatprep.subr.bf16.mxu0 %v4746_v27  ;;  %v4813_v27 = vld [vmem:[#allocation4 + $0x120] ss:$16 sps:$4 sm:$0xff]  }
 0x1e9   :  { %2848 = vmatpush1.bf16.msra.mxu1 %v4807_v23 }
 0x1ea   :  { %2238 = vmatmul.mubr.bf16.gmra.mrb[4].mxu0 %v3910_v30  ;;  %2849 = vmatprep.subr.bf16.mxu1 %v4812_v24  ;;  %v4821_v30 = vld [vmem:[#allocation4 + $0x164] ss:$16 sps:$4 sm:$0xff]  }
 0x1eb   :  { %2253 = vmatpush1.bf16.msra.mxu0 %v4744_v31  ;;  %2280 = vmatprep.mubr.bf16.mxu0 %v3897_v32  ;;  %v4819_v31 = vld [vmem:[#allocation4 + $0x160] ss:$16 sps:$4 sm:$0xff]   ;;  %v4824_v32 = vld [vmem:[#allocation4 + $0x184] ss:$16 sps:$4 sm:$0xff]  }
 0x1ec   :  { %2254 = vmatprep.subr.bf16.mxu0 %v4749_v33  ;;  %v4822_v33 = vld [vmem:[#allocation4 + $0x180] ss:$16 sps:$4 sm:$0xff]  }
 0x1ed   :  { %2850 = vmatpush1.bf16.msra.mxu1 %v4810_v25 }
 0x1ee   :  { %2851 = vmatprep.subr.bf16.mxu1 %v4815_v26 }
 0x1ef   :  { %2255 = vmatpush1.bf16.msra.mxu0 %v4747_v34  ;;  %v4825_v34 = vld [vmem:[#allocation4 + $0x1a0] ss:$16 sps:$4 sm:$0xff]  }
 0x1f0   :  { %2256 = vmatprep.subr.bf16.mxu0 %v4752_v35  ;;  %v4827_v35 = vld [vmem:[#allocation4 + $0x1a4] ss:$16 sps:$4 sm:$0xff]  }
 0x1f1   :  { %2852 = vmatpush1.bf16.msra.mxu1 %v4813_v27 }
 0x1f2   :  { %2853 = vmatprep.subr.bf16.mxu1 %v4818_v28 }
 0x1f3   :  { %2257 = vmatpush1.bf16.msra.mxu0 %v4750_v36  ;;  %v4830_v36 = vld [vmem:[#allocation4 + $0x1c4] ss:$16 sps:$4 sm:$0xff]  }
 0x1f4   :  { %2258 = vmatprep.subr.bf16.mxu0 %v4755_v37  ;;  %v4828_v37 = vld [vmem:[#allocation4 + $0x1c0] ss:$16 sps:$4 sm:$0xff]  }
 0x1f5   :  { %2854 = vmatpush1.bf16.msra.mxu1 %v4816_v29 }
 0x1f6   :  { %2855 = vmatprep.subr.bf16.mxu1 %v4821_v30 }
 0x1f7   :  { %2259 = vmatpush1.bf16.msra.mxu0 %v4753_v38  ;;  %v4833_v38 = vld [vmem:[#allocation4 + $0x1e4] ss:$16 sps:$4 sm:$0xff]  }
 0x1f8   :  { %2260 = vmatprep.subr.bf16.mxu0 %v4758_v39  ;;  %v4831_v39 = vld [vmem:[#allocation4 + $0x1e0] ss:$16 sps:$4 sm:$0xff]  }
 0x1f9   :  { %2856 = vmatpush1.bf16.msra.mxu1 %v4819_v31 }
 0x1fa   :  { %2857 = vmatprep.subr.bf16.mxu1 %v4824_v32 }
 0x1fb   :  { %2261 = vmatpush1.bf16.msra.mxu0 %v4756_v40  ;;  %v4836_v40 = vld [vmem:[#allocation4 + $0xc] ss:$16 sps:$4 sm:$0xff]  }
 0x1fc   :  { %2262 = vmatprep.subr.bf16.mxu0 %v4761_v41 }
 0x1fd   :  { %2858 = vmatpush1.bf16.msra.mxu1 %v4822_v33 }
 0x1fe   :  { %2859 = vmatprep.subr.bf16.mxu1 %v4827_v35 }
 0x1ff   :  { %2263 = vmatpush1.bf16.msra.mxu0 %v4759_v42 }
 0x200   :  { %2264 = vmatprep.subr.bf16.mxu0 %v4764_v43 }
 0x201   :  { %2860 = vmatpush1.bf16.msra.mxu1 %v4825_v34 }
 0x202   :  { %2861 = vmatprep.subr.bf16.mxu1 %v4830_v36 }
 0x203   :  { %2265 = vmatpush1.bf16.msra.mxu0 %v4762_v44 }
 0x204   :  { %2266 = vmatprep.subr.bf16.mxu0 %v4767_v45 }
 0x205   :  { %2862 = vmatpush1.bf16.msra.mxu1 %v4828_v37 }
 0x206   :  { %2863 = vmatprep.subr.bf16.mxu1 %v4833_v38 }
 0x207   :  { %2267 = vmatpush1.bf16.msra.mxu0 %v4765_v48 }
 0x208   :  { %2268 = vmatprep.subr.bf16.mxu0 %v4770_v49  ;;  %v5490_v2 = vpop.f32.mrb[0].mxu1 }
 0x209   :  { %v5492_v3 = vpop.f32.mrb[1].mxu1  ;;  %2864 = vmatpush1.bf16.msra.mxu1 %v4831_v39 }
 0x20a   :  { %v5494_v4 = vpop.f32.mrb[2].mxu1  ;;  %2886 = vmatprep.subr.bf16.mxu1 %v4836_v40 }
 0x20b   :  { %2269 = vmatpush1.bf16.msra.mxu0 %v4768_v50  ;;  %v5496_v5 = vpop.f32.mrb[3].mxu1 }
 0x20c   :  { %2270 = vmatprep.subr.bf16.mxu0 %v4773_v51 }
 0x20f   :  { %2271 = vmatpush1.bf16.msra.mxu0 %v4771_v52 }
 0x210   :  { %2272 = vmatprep.subr.bf16.mxu0 %v4776_v53 }
 0x213   :  { %2273 = vmatpush1.bf16.msra.mxu0 %v4774_v54 }
 0x214   :  { %2274 = vmatprep.subr.bf16.mxu0 %v4779_v55 }
 0x217   :  { %2275 = vmatpush1.bf16.msra.mxu0 %v4777_v56 }
 0x218   :  { %2276 = vmatprep.subr.bf16.mxu0 %v4782_v57 }
 0x21b   :  { %2277 = vmatpush1.bf16.msra.mxu0 %v4780_v58 }
 0x21c   :  { %2278 = vmatprep.subr.bf16.mxu0 %v4785_v59 }
 0x21f   :  { %2279 = vmatpush1.bf16.msra.mxu0 %v4783_v60 }
 0x222   :  { %2281 = vmatmul.mubr.bf16.vlgmr.msra.gmra.mrb[0].mxu0 %v3896_v63 }
 0x223   :  { %2290 = vmatprep.mubr.bf16.mxu0 %v3913_v0 }
 0x226   :  { %v5498_v6 = vpop.f32.mrb[4].mxu1 }
 0x227   :  { %v5500_v7 = vpop.f32.mrb[5].mxu1 }
 0x228   :  { %v5502_v8 = vpop.f32.mrb[6].mxu1 }
 0x229   :  { %v5504_v9 = vpop.f32.mrb[7].mxu1 }
 0x22a   :  { %2291 = vmatmul.mubr.bf16.gmra.mrb[4].mxu0 %v3912_v1 }
 0x2f5   :  { %v2282_v41 = vpop.f32.mrb[0].mxu0 }
 0x2f6   :  { %v5507_v42 = vadd.f32 %v2282_v41, %v5490_v2  ;;  %v2284_v43 = vpop.f32.mrb[1].mxu0 }
 0x2f7   :  { %v5510_v44 = vadd.f32 %v2284_v43, %v5492_v3  ;;  %v2286_v45 = vpop.f32.mrb[2].mxu0 }
 0x2f8   :  { %v5513_v48 = vadd.f32 %v2286_v45, %v5494_v4  ;;  %v2288_v49 = vpop.f32.mrb[3].mxu0  ;;  %v2321_v51 = vmul.f32 %v5507_v42, %v5507_v42 }
 0x2f9   :  { %v5516_v50 = vadd.f32 %v2288_v49, %v5496_v5  ;;  %v2322_v54 = vmul.f32 %v5510_v44, %v5510_v44 }
 0x2fa   :  { %v2303_v52 = vadd.f32 %v5513_v48, %v5507_v42  ;;  %v2323_v53 = vmul.f32 %v5513_v48, %v5513_v48 }
 0x2fb   :  { %v2312_v55 = vadd.f32 %v5516_v50, %v5510_v44  ;;  %v2324_v56 = vmul.f32 %v5516_v50, %v5516_v50 }
 0x2fc   :  { %v2329_v57 = vadd.f32 %v2323_v53, %v2321_v51  ;;  %v5183_v53 = vmov 1966171168  }
 0x2fd   :  { %v2338_v58 = vadd.f32 %v2324_v56, %v2322_v54  ;;  %v2292_v59 = vpop.f32.mrb[4].mxu0  ;;  %v2363_v54 = vunpack.c.l.s4 %v5183_v53  ;;  %v4849_v53 = vld [vmem:[#allocation4 + $0xa8] ss:$16 sps:$4 sm:$0xff]  }
 0x2fe   :  { %v5531_v60 = vadd.f32 %v2292_v59, %v5498_v6  ;;  %v2294_v61 = vpop.f32.mrb[5].mxu0 }
 0x2ff   :  { %v5534_v62 = vadd.f32 %v2294_v61, %v5500_v7  ;;  %v2296_v63 = vpop.f32.mrb[6].mxu0  ;;  %v2364_v56 = vunpack.c.0.s8 %v2363_v54  ;;  %v4854_v54 = vld [vmem:[#allocation4 + $0xcc] ss:$16 sps:$4 sm:$0xff]  }
 0x300   :  { %v2304_v0 = vadd.f32 %v5531_v60, %v2303_v52  ;;  %v2325_v1 = vmul.f32 %v5531_v60, %v5531_v60  ;;  %v5540_v2 = vadd.f32 %v2296_v63, %v5502_v8  ;;  %v2298_v3 = vpop.f32.mrb[7].mxu0 }
 0x301   :  { %v2313_v4 = vadd.f32 %v5534_v62, %v2312_v55  ;;  %v2326_v5 = vmul.f32 %v5534_v62, %v5534_v62  ;;  %v5546_v6 = vadd.f32 %v2298_v3, %v5504_v9  ;;  %v2365_v55 = vlaneseq }
 0x302   :  { %v2330_v7 = vadd.f32 %v2329_v57, %v2325_v1  ;;  %v2305_v10 = vadd.f32 %v5540_v2, %v2304_v0  ;;  %v2327_v46 = vmul.f32 %v5540_v2, %v5540_v2  ;;  %v2301_v1 = vld [vmem:[#allocation7] sm:$0x3] }
 0x303   :  { %v2339_v47 = vadd.f32 %v2338_v58, %v2326_v5  ;;  %v2314_v11 = vadd.f32 %v5546_v6, %v2313_v4  ;;  %v2328_v8 = vmul.f32 %v5546_v6, %v5546_v6  ;;  %v2366_v57 = vshrl.u32 %v2365_v55, 7  ;;  %v4852_v55 = vld [vmem:[#allocation4 + $0xc8] ss:$16 sps:$4 sm:$0xff]  }
 0x304   :  { %v2306_v12 = vrot.slane %v2305_v10, 4  ;;  %v2331_v13 = vadd.f32 %v2330_v7, %v2327_v46 }
 0x305   :  { %v2315_v14 = vrot.slane %v2314_v11, 4  ;;  %v2340_v15 = vadd.f32 %v2339_v47, %v2328_v8  ;;  %v5554_v59 = vsub.s32 %v2364_v56, %v2366_v57  ;;  %v5558_v4 = vsub.s32 0, %v2366_v57  ;;  %v4857_v56 = vld [vmem:[#allocation4 + $0xec] ss:$16 sps:$4 sm:$0xff]  }
 0x306   :  { %v2307_v16 = vadd.f32 %v2306_v12, %v2305_v10  ;;  %v2332_v17 = vrot.slane %v2331_v13, 4  ;;  %v5560_v5 = vsub.s32 1, %v2366_v57  ;;  %v4855_v57 = vld [vmem:[#allocation4 + $0xe8] ss:$16 sps:$4 sm:$0xff]  }
 0x307   :  { %v2316_v9 = vadd.f32 %v2315_v14, %v2314_v11  ;;  %v2341_v18 = vrot.slane %v2340_v15, 4 }
 0x308   :  { %v2308_v19 = vrot.slane %v2307_v16, 2  ;;  %v2333_v20 = vadd.f32 %v2332_v17, %v2331_v13 }
 0x309   :  { %v2317_v21 = vrot.slane %v2316_v9, 2  ;;  %v2342_v22 = vadd.f32 %v2341_v18, %v2340_v15 }
 0x30a   :  { %v2309_v23 = vadd.f32 %v2308_v19, %v2307_v16  ;;  %v2334_v24 = vrot.slane %v2333_v20, 2 }
 0x30b   :  { %v2318_v25 = vadd.f32 %v2317_v21, %v2316_v9  ;;  %v2343_v26 = vrot.slane %v2342_v22, 2 }
 0x30c   :  { %v2310_v27 = vrot.slane %v2309_v23, 1  ;;  %v2335_v28 = vadd.f32 %v2334_v24, %v2333_v20  ;;  %v2302_v20 = vld [vmem:[#allocation9] sm:$0x3] }
 0x30d   :  { %v2319_v29 = vrot.slane %v2318_v25, 1  ;;  %v2344_v30 = vadd.f32 %v2343_v26, %v2342_v22 }
 0x30e   :  { %v2311_v31 = vadd.f32 %v2310_v27, %v2309_v23  ;;  %v2336_v32 = vrot.slane %v2335_v28, 1 }
 0x30f   :  { %v2320_v33 = vadd.f32 %v2319_v29, %v2318_v25  ;;  %v2345_v34 = vrot.slane %v2344_v30, 1 }
 0x310   :  { %v2337_v35 = vadd.f32 %v2336_v32, %v2335_v28  ;;  %v2347_v36 = vmul.f32 0.03125, %v2311_v31 }
 0x311   :  { %v2346_v37 = vadd.f32 %v2345_v34, %v2344_v30  ;;  %v2348_v38 = vmul.f32 0.03125, %v2320_v33  ;;  %v4834_v34 = vld [vmem:[#allocation4 + $0x8] ss:$16 sps:$4 sm:$0xff]  }
 0x312   :  { %v2349_v39 = vmul.f32 0.03125, %v2337_v35  ;;  %v2351_v40 = vmul.f32 %v2347_v36, %v2347_v36 }
 0x313   :  { %v2350_v41 = vmul.f32 0.03125, %v2346_v37  ;;  %v2352_v43 = vmul.f32 %v2348_v38, %v2348_v38  ;;  %v4839_v37 = vld [vmem:[#allocation4 + $0x2c] ss:$16 sps:$4 sm:$0xff]  }
 0x314   :  { %v2353_v45 = vsub.f32 %v2349_v39, %v2351_v40  ;;  %v4837_v39 = vld [vmem:[#allocation4 + $0x28] ss:$16 sps:$4 sm:$0xff]   ;;  %v4842_v40 = vld [vmem:[#allocation4 + $0x4c] ss:$16 sps:$4 sm:$0xff]  }
 0x315   :  { %v2354_v49 = vsub.f32 %v2350_v41, %v2352_v43  ;;  %v4840_v41 = vld [vmem:[#allocation4 + $0x48] ss:$16 sps:$4 sm:$0xff]   ;;  %v4845_v43 = vld [vmem:[#allocation4 + $0x6c] ss:$16 sps:$4 sm:$0xff]  }
 0x316   :  { %v2355_v51 = vadd.f32 1e-05, %v2353_v45  ;;  %v4843_v45 = vld [vmem:[#allocation4 + $0x68] ss:$16 sps:$4 sm:$0xff]  }
 0x317   :  { %v2356_v52 = vadd.f32 1e-05, %v2354_v49  ;;  %v4848_v49 = vld [vmem:[#allocation4 + $0x8c] ss:$16 sps:$4 sm:$0xff]  }
 0x318   :  { %4922 = vrsqrt.f32 %v2355_v51  ;;  %v4846_v51 = vld [vmem:[#allocation4 + $0x88] ss:$16 sps:$4 sm:$0xff]  }
 0x319   :  { %4924 = vrsqrt.f32 %v2356_v52  ;;  %v4851_v52 = vld [vmem:[#allocation4 + $0xac] ss:$16 sps:$4 sm:$0xff]  }
 0x322   :  { %v4923_v58 = vpop.eup %4922 }
 0x323   :  { %v4925_v61 = vpop.eup %4924 }
 0x324   :  { %v2361_v63 = vcombine.low %v4923_v58, %v4925_v61  ;;  %v4860_v58 = vld [vmem:[#allocation4 + $0x10c] ss:$16 sps:$4 sm:$0xff]   ;;  %v4858_v61 = vld [vmem:[#allocation4 + $0x108] ss:$16 sps:$4 sm:$0xff]  }
 0x326   :  { %v2368_v0 = vrot.slane %v2361_v63, %v5554_v59  ;;  %v4863_v63 = vld [vmem:[#allocation4 + $0x12c] ss:$16 sps:$4 sm:$0xff]  }
 0x328   :  { %v2375_v3 = vrot.slane %v2368_v0, %v5554_v59  ;;  %v4861_v0 = vld [vmem:[#allocation4 + $0x128] ss:$16 sps:$4 sm:$0xff]  }
 0x32a   :  { %v2377_v7 = vmul.f32 %v2375_v3, %v2301_v1  ;;  %v4866_v1 = vld [vmem:[#allocation4 + $0x14c] ss:$16 sps:$4 sm:$0xff]   ;;  %v4864_v3 = vld [vmem:[#allocation4 + $0x148] ss:$16 sps:$4 sm:$0xff]  }
 0x32c   :  { %v2382_v10 = vrot.slane %v2377_v7, %v5558_v4  ;;  %v2386_v46 = vrot.slane %v2377_v7, %v5560_v5  ;;  %v4869_v7 = vld [vmem:[#allocation4 + $0x16c] ss:$16 sps:$4 sm:$0xff]  }
 0x32e   :  { %v2389_v47 = vmul.f32 %v2382_v10, %v2347_v36  ;;  %v2390_v11 = vmul.f32 %v2386_v46, %v2348_v38  ;;  %v2417_v8 = vmul.f32 %v5546_v6, %v2386_v46  ;;  %v2411_v12 = vmul.f32 %v5510_v44, %v2386_v46 }
 0x32f   :  { %v2413_v13 = vmul.f32 %v5516_v50, %v2386_v46  ;;  %v2410_v14 = vmul.f32 %v5507_v42, %v2382_v10  ;;  %v2412_v15 = vmul.f32 %v5513_v48, %v2382_v10  ;;  %v2415_v16 = vmul.f32 %v5534_v62, %v2386_v46  ;;  %v4872_v46 = vld [vmem:[#allocation4 + $0x18c] ss:$16 sps:$4 sm:$0xff]  }
 0x330   :  { %v2393_v17 = vcombine.low %v2389_v47, %v2390_v11  ;;  %v2414_v9 = vmul.f32 %v5531_v60, %v2382_v10  ;;  %v2416_v18 = vmul.f32 %v5540_v2, %v2382_v10  ;;  %v4867_v10 = vld [vmem:[#allocation4 + $0x168] ss:$16 sps:$4 sm:$0xff]   ;;  %v4875_v11 = vld [vmem:[#allocation4 + $0x1ac] ss:$16 sps:$4 sm:$0xff]  }
 0x331   :  { %v4870_v47 = vld [vmem:[#allocation4 + $0x188] ss:$16 sps:$4 sm:$0xff]  }
 0x332   :  { %v2400_v19 = vrot.slane %v2393_v17, %v5554_v59  ;;  %v4882_v17 = vld [vmem:[#allocation6] ss:$8 sps:$4 sm:$0xff]  }
 0x334   :  { %v2407_v6 = vrot.slane %v2400_v19, %v5554_v59  ;;  %v4890_v19 = vld [vmem:[#allocation6 + $0x24] ss:$8 sps:$4 sm:$0xff]  }
 0x336   :  { %v2409_v21 = vsub.f32 %v2302_v20, %v2407_v6  ;;  %v4888_v20 = vld [vmem:[#allocation6 + $0x20] ss:$8 sps:$4 sm:$0xff]   ;;  %v4893_v6 = vld [vmem:[#allocation6 + $0x34] ss:$8 sps:$4 sm:$0xff]  }
 0x338   :  { %v2422_v44 = vrot.slane %v2409_v21, %v5558_v4  ;;  %v2426_v50 = vrot.slane %v2409_v21, %v5560_v5  ;;  %v4891_v21 = vld [vmem:[#allocation6 + $0x30] ss:$8 sps:$4 sm:$0xff]  }
 0x33a   :  { %v2430_v42 = vadd.f32 %v2426_v50, %v2411_v12  ;;  %v2432_v22 = vadd.f32 %v2426_v50, %v2413_v13  ;;  %v2429_v48 = vadd.f32 %v2422_v44, %v2410_v14  ;;  %v2431_v23 = vadd.f32 %v2422_v44, %v2412_v15  ;;  %v4878_v12 = vld [vmem:[#allocation4 + $0x1cc] ss:$16 sps:$4 sm:$0xff]   ;;  %v4876_v13 = vld [vmem:[#allocation4 + $0x1c8] ss:$16 sps:$4 sm:$0xff]  }
 0x33b   :  { %v2434_v62 = vadd.f32 %v2426_v50, %v2415_v16  ;;  %v2436_v24 = vadd.f32 %v2426_v50, %v2417_v8  ;;  %v2433_v25 = vadd.f32 %v2422_v44, %v2414_v9  ;;  %v2435_v60 = vadd.f32 %v2422_v44, %v2416_v18  ;;  %v4873_v8 = vld [vmem:[#allocation4 + $0x1a8] ss:$16 sps:$4 sm:$0xff]   ;;  %v4881_v14 = vld [vmem:[#allocation4 + $0x1ec] ss:$16 sps:$4 sm:$0xff]  }
 0x33c   :  { %v2438_v26 = vmax.f32 %v2430_v42, 0.0  ;;  %v2440_v2 = vmax.f32 %v2432_v22, 0.0  ;;  %v2437_v27 = vmax.f32 %v2429_v48, 0.0  ;;  %v2439_v28 = vmax.f32 %v2431_v23, 0.0  ;;  %v4879_v15 = vld [vmem:[#allocation4 + $0x1e8] ss:$16 sps:$4 sm:$0xff]  }
 0x33d   :  { %v2442_v29 = vmax.f32 %v2434_v62, 0.0  ;;  %v2444_v30 = vmax.f32 %v2436_v24, 0.0  ;;  %v2441_v31 = vmax.f32 %v2433_v25, 0.0  ;;  %v2443_v32 = vmax.f32 %v2435_v60, 0.0  ;;  %v4884_v16 = vld [vmem:[#allocation6 + $0x4] ss:$8 sps:$4 sm:$0xff]  }
 0x33e   :  { %v2446_v33 = vpack.c.bf16 %v2440_v2, %v2438_v26  ;;  %v5576_v35 = vpack.c.bf16 %v2439_v28, %v2437_v27  ;;  %v4887_v9 = vld [vmem:[#allocation6 + $0x14] ss:$8 sps:$4 sm:$0xff]   ;;  %v4885_v18 = vld [vmem:[#allocation6 + $0x10] ss:$8 sps:$4 sm:$0xff]   ;;  %v4896_v44 = vld [vmem:[#allocation6 + $0x44] ss:$8 sps:$4 sm:$0xff]  }
 0x33f   :  { %v5578_v36 = vpack.c.bf16 %v2444_v30, %v2442_v29  ;;  %v5580_v38 = vpack.c.bf16 %v2443_v32, %v2441_v31  ;;  %v4894_v50 = vld [vmem:[#allocation6 + $0x40] ss:$8 sps:$4 sm:$0xff]   ;;  %v4899_v42 = vld [vmem:[#allocation6 + $0x54] ss:$8 sps:$4 sm:$0xff]   ;;  %v4897_v22 = vld [vmem:[#allocation6 + $0x50] ss:$8 sps:$4 sm:$0xff]  }
 0x340   :  { %2865 = vmatprep.mubr.bf16.mxu1 %v2446_v33  ;;  %v4902_v48 = vld [vmem:[#allocation6 + $0x64] ss:$8 sps:$4 sm:$0xff]   ;;  %v4900_v23 = vld [vmem:[#allocation6 + $0x60] ss:$8 sps:$4 sm:$0xff]   ;;  %v4903_v62 = vld [vmem:[#allocation6 + $0x70] ss:$8 sps:$4 sm:$0xff]  }
 0x341   :  { %2866 = vmatmul.mubr.bf16.vlgmr.msra.gmra.mrb[8].mxu1 %v5576_v35  ;;  %v4905_v24 = vld [vmem:[#allocation6 + $0x74] ss:$8 sps:$4 sm:$0xff]   ;;  %v5184_v25 = vmov 0  }
 0x342   :  { %2887 = vmatpush1.bf16.msra.mxu1 %v4834_v34  ;;  %2875 = vmatprep.mubr.bf16.mxu1 %v5578_v36 }
 0x343   :  { %2888 = vmatprep.subr.bf16.mxu1 %v4839_v37 }
 0x346   :  { %2889 = vmatpush1.bf16.msra.mxu1 %v4837_v39 }
 0x347   :  { %2890 = vmatprep.subr.bf16.mxu1 %v4842_v40 }
 0x349   :  { %2876 = vmatmul.mubr.bf16.gmra.mrb[12].mxu1 %v5580_v38 }
 0x34a   :  { %2891 = vmatpush1.bf16.msra.mxu1 %v4840_v41  ;;  %2918 = vmatprep.mubr.bf16.mxu1 %v2446_v33 }
 0x34b   :  { %2892 = vmatprep.subr.bf16.mxu1 %v4845_v43 }
 0x34e   :  { %2893 = vmatpush1.bf16.msra.mxu1 %v4843_v45 }
 0x34f   :  { %2894 = vmatprep.subr.bf16.mxu1 %v4848_v49 }
 0x352   :  { %2895 = vmatpush1.bf16.msra.mxu1 %v4846_v51 }
 0x353   :  { %2896 = vmatprep.subr.bf16.mxu1 %v4851_v52 }
 0x356   :  { %2897 = vmatpush1.bf16.msra.mxu1 %v4849_v53 }
 0x357   :  { %2898 = vmatprep.subr.bf16.mxu1 %v4854_v54 }
 0x35a   :  { %2899 = vmatpush1.bf16.msra.mxu1 %v4852_v55 }
 0x35b   :  { %2900 = vmatprep.subr.bf16.mxu1 %v4857_v56 }
 0x35e   :  { %2901 = vmatpush1.bf16.msra.mxu1 %v4855_v57 }
 0x35f   :  { %2902 = vmatprep.subr.bf16.mxu1 %v4860_v58 }
 0x362   :  { %2903 = vmatpush1.bf16.msra.mxu1 %v4858_v61 }
 0x363   :  { %2904 = vmatprep.subr.bf16.mxu1 %v4863_v63 }
 0x366   :  { %2905 = vmatpush1.bf16.msra.mxu1 %v4861_v0 }
 0x367   :  { %2906 = vmatprep.subr.bf16.mxu1 %v4866_v1 }
 0x36a   :  { %2907 = vmatpush1.bf16.msra.mxu1 %v4864_v3 }
 0x36b   :  { %2908 = vmatprep.subr.bf16.mxu1 %v4869_v7 }
 0x36e   :  { %2909 = vmatpush1.bf16.msra.mxu1 %v4867_v10 }
 0x36f   :  { %2910 = vmatprep.subr.bf16.mxu1 %v4872_v46 }
 0x372   :  { %2911 = vmatpush1.bf16.msra.mxu1 %v4870_v47 }
 0x373   :  { %2912 = vmatprep.subr.bf16.mxu1 %v4875_v11 }
 0x376   :  { %2913 = vmatpush1.bf16.msra.mxu1 %v4873_v8 }
 0x377   :  { %2914 = vmatprep.subr.bf16.mxu1 %v4878_v12 }
 0x37a   :  { %2915 = vmatpush1.bf16.msra.mxu1 %v4876_v13 }
 0x37b   :  { %2916 = vmatprep.subr.bf16.mxu1 %v4881_v14 }
 0x37e   :  { %2917 = vmatpush1.bf16.msra.mxu1 %v4879_v15 }
 0x37f   :  { %3172 = vmatprep.subr.bf16.mxu1 %v4884_v16 }
 0x381   :  { %2919 = vmatmul.mubr.bf16.vlgmr.msra.gmra.mrb[16].mxu1 %v5576_v35 }
 0x382   :  { %2928 = vmatprep.mubr.bf16.mxu1 %v5578_v36  ;;  %3173 = vmatpush1.bf16.msra.mxu1 %v4882_v17 }
 0x383   :  { %3174 = vmatprep.subr.bf16.mxu1 %v4887_v9 }
 0x386   :  { %3175 = vmatpush1.bf16.msra.mxu1 %v4885_v18 }
 0x387   :  { %3176 = vmatprep.subr.bf16.mxu1 %v4890_v19 }
 0x389   :  { %2929 = vmatmul.mubr.bf16.gmra.mrb[20].mxu1 %v5580_v38 }
 0x38a   :  { %3177 = vmatpush1.bf16.msra.mxu1 %v4888_v20  ;;  %3204 = vmatprep.mubr.bf16.mxu1 %v5184_v25 }
 0x38b   :  { %3178 = vmatprep.subr.bf16.mxu1 %v4893_v6 }
 0x38e   :  { %3179 = vmatpush1.bf16.msra.mxu1 %v4891_v21 }
 0x38f   :  { %3180 = vmatprep.subr.bf16.mxu1 %v4896_v44 }
 0x392   :  { %3181 = vmatpush1.bf16.msra.mxu1 %v4894_v50 }
 0x393   :  { %3182 = vmatprep.subr.bf16.mxu1 %v4899_v42 }
 0x396   :  { %3183 = vmatpush1.bf16.msra.mxu1 %v4897_v22 }
 0x397   :  { %3184 = vmatprep.subr.bf16.mxu1 %v4902_v48 }
 0x39a   :  { %3185 = vmatpush1.bf16.msra.mxu1 %v4900_v23 }
 0x39b   :  { %3186 = vmatprep.subr.bf16.mxu1 %v4905_v24 }
 0x39e   :  { %3187 = vmatpush1.bf16.msra.mxu1 %v4903_v62 }
 0x414   :  { %v5589_v60 = vpop.f32.mrb[8].mxu1 }
 0x415   :  { %v5591_v26 = vpop.f32.mrb[9].mxu1  ;;  %v2962_v27 = vmul.f32 %v5589_v60, %v5589_v60 }
 0x416   :  { %v5593_v2 = vpop.f32.mrb[10].mxu1  ;;  %v2966_v41 = vmul.f32 %v5591_v26, %v5591_v26 }
 0x417   :  { %v2941_v28 = vadd.f32 %v5593_v2, %v5589_v60  ;;  %v2963_v29 = vmul.f32 %v5593_v2, %v5593_v2  ;;  %v5601_v30 = vpop.f32.mrb[11].mxu1 }
 0x418   :  { %v2967_v49 = vmul.f32 %v5601_v30, %v5601_v30 }
 0x419   :  { %v2978_v31 = vadd.f32 %v2963_v29, %v2962_v27 }
 0x41c   :  { %v5603_v32 = vpop.f32.mrb[12].mxu1 }
 0x41d   :  { %v2942_v33 = vadd.f32 %v2941_v28, %v5603_v32  ;;  %v2964_v34 = vmul.f32 %v5603_v32, %v5603_v32  ;;  %v5608_v35 = vpop.f32.mrb[13].mxu1 }
 0x41e   :  { %v5610_v36 = vpop.f32.mrb[14].mxu1  ;;  %v2968_v53 = vmul.f32 %v5608_v35, %v5608_v35 }
 0x41f   :  { %v2979_v37 = vadd.f32 %v2978_v31, %v2964_v34  ;;  %v2943_v38 = vadd.f32 %v2942_v33, %v5610_v36  ;;  %v2965_v39 = vmul.f32 %v5610_v36, %v5610_v36  ;;  %v5615_v40 = vpop.f32.mrb[15].mxu1 }
 0x420   :  { %v2969_v57 = vmul.f32 %v5615_v40, %v5615_v40 }
 0x421   :  { %v2944_v43 = vadd.f32 %v2943_v38, %v5591_v26  ;;  %v2980_v45 = vadd.f32 %v2979_v37, %v2965_v39 }
 0x423   :  { %v2981_v51 = vadd.f32 %v2980_v45, %v2966_v41  ;;  %v2945_v52 = vadd.f32 %v2944_v43, %v5601_v30 }
 0x425   :  { %v2946_v54 = vadd.f32 %v2945_v52, %v5608_v35  ;;  %v2982_v55 = vadd.f32 %v2981_v51, %v2967_v49 }
 0x427   :  { %v2947_v56 = vadd.f32 %v2946_v54, %v5615_v40  ;;  %v2983_v58 = vadd.f32 %v2982_v55, %v2968_v53 }
 0x429   :  { %v2984_v61 = vadd.f32 %v2983_v58, %v2969_v57  ;;  %v2939_v57 = vld [vmem:[#allocation10] sm:$0x1] }
 0x454   :  { %v5629_v63 = vpop.f32.mrb[16].mxu1 }
 0x455   :  { %v2948_v0 = vadd.f32 %v2947_v56, %v5629_v63  ;;  %v2970_v1 = vmul.f32 %v5629_v63, %v5629_v63  ;;  %v5634_v3 = vpop.f32.mrb[17].mxu1 }
 0x456   :  { %v5636_v7 = vpop.f32.mrb[18].mxu1  ;;  %v2974_v20 = vmul.f32 %v5634_v3, %v5634_v3 }
 0x457   :  { %v2985_v10 = vadd.f32 %v2984_v61, %v2970_v1  ;;  %v2949_v46 = vadd.f32 %v2948_v0, %v5636_v7  ;;  %v2971_v47 = vmul.f32 %v5636_v7, %v5636_v7  ;;  %v5641_v11 = vpop.f32.mrb[19].mxu1  ;;  %v2940_v0 = vld [vmem:[#allocation12] sm:$0x1] }
 0x458   :  { %v2975_v44 = vmul.f32 %v5641_v11, %v5641_v11 }
 0x459   :  { %v2986_v8 = vadd.f32 %v2985_v10, %v2971_v47 }
 0x45c   :  { %v2930_v12 = vpop.f32.mrb[20].mxu1 }
 0x45d   :  { %v2950_v13 = vadd.f32 %v2949_v46, %v2930_v12  ;;  %v2972_v14 = vmul.f32 %v2930_v12, %v2930_v12  ;;  %v5643_v15 = vpop.f32.mrb[21].mxu1 }
 0x45e   :  { %v2934_v16 = vpop.f32.mrb[22].mxu1  ;;  %v2976_v22 = vmul.f32 %v5643_v15, %v5643_v15 }
 0x45f   :  { %v2987_v17 = vadd.f32 %v2986_v8, %v2972_v14  ;;  %v2951_v9 = vadd.f32 %v2950_v13, %v2934_v16  ;;  %v2973_v18 = vmul.f32 %v2934_v16, %v2934_v16  ;;  %v2936_v19 = vpop.f32.mrb[23].mxu1 }
 0x460   :  { %v2977_v24 = vmul.f32 %v2936_v19, %v2936_v19 }
 0x461   :  { %v2952_v6 = vadd.f32 %v2951_v9, %v5634_v3  ;;  %v2988_v21 = vadd.f32 %v2987_v17, %v2973_v18 }
 0x463   :  { %v2989_v50 = vadd.f32 %v2988_v21, %v2974_v20  ;;  %v2953_v42 = vadd.f32 %v2952_v6, %v5641_v11 }
 0x465   :  { %v2954_v48 = vadd.f32 %v2953_v42, %v5643_v15  ;;  %v2990_v23 = vadd.f32 %v2989_v50, %v2975_v44 }
 0x467   :  { %v2955_v62 = vadd.f32 %v2954_v48, %v2936_v19  ;;  %v2991_v27 = vadd.f32 %v2990_v23, %v2976_v22 }
 0x469   :  { %v2956_v28 = vrot.slane %v2955_v62, 4  ;;  %v2992_v29 = vadd.f32 %v2991_v27, %v2977_v24 }
 0x46b   :  { %v2957_v31 = vadd.f32 %v2956_v28, %v2955_v62  ;;  %v2993_v33 = vrot.slane %v2992_v29, 4 }
 0x46d   :  { %v2958_v34 = vrot.slane %v2957_v31, 2  ;;  %v2994_v37 = vadd.f32 %v2993_v33, %v2992_v29 }
 0x46f   :  { %v2959_v38 = vadd.f32 %v2958_v34, %v2957_v31  ;;  %v2995_v39 = vrot.slane %v2994_v37, 2 }
 0x471   :  { %v2960_v41 = vrot.slane %v2959_v38, 1  ;;  %v2996_v43 = vadd.f32 %v2995_v39, %v2994_v37 }
 0x473   :  { %v2961_v45 = vadd.f32 %v2960_v41, %v2959_v38  ;;  %v2997_v49 = vrot.slane %v2996_v43, 1 }
 0x475   :  { %v2998_v51 = vadd.f32 %v2997_v49, %v2996_v43  ;;  %v2999_v52 = vmul.f32 0.0078125, %v2961_v45 }
 0x477   :  { %v3000_v53 = vmul.f32 0.0078125, %v2998_v51  ;;  %v3001_v54 = vmul.f32 %v2999_v52, %v2999_v52 }
 0x479   :  { %v3002_v55 = vsub.f32 %v3000_v53, %v3001_v54 }
 0x47b   :  { %v3003_v56 = vadd.f32 1e-05, %v3002_v55 }
 0x47d   :  { %4926 = vrsqrt.f32 %v3003_v56 }
 0x487   :  { %v4927_v58 = vpop.eup %4926 }
 0x488   :  { %v3005_v61 = vmul.f32 %v4927_v58, %v2939_v57 }
 0x48a   :  { %v3006_v1 = vmul.f32 %v3005_v61, %v2999_v52  ;;  %v3012_v10 = vrot.slane %v3005_v61, %v5558_v4 }
 0x48c   :  { %v3007_v46 = vsub.f32 %v2940_v0, %v3006_v1  ;;  %v3029_v47 = vmul.f32 %v3012_v10, %v2936_v19  ;;  %v3014_v8 = vmul.f32 %v3012_v10, %v5589_v60  ;;  %v3015_v13 = vmul.f32 %v3012_v10, %v5593_v2 }
 0x48d   :  { %v3016_v14 = vmul.f32 %v3012_v10, %v5603_v32  ;;  %v3017_v17 = vmul.f32 %v3012_v10, %v5610_v36  ;;  %v3018_v9 = vmul.f32 %v3012_v10, %v5591_v26  ;;  %v3019_v18 = vmul.f32 %v3012_v10, %v5601_v30 }
 0x48e   :  { %v3034_v20 = vrot.slane %v3007_v46, %v5558_v4  ;;  %v3020_v6 = vmul.f32 %v3012_v10, %v5608_v35  ;;  %v3021_v21 = vmul.f32 %v3012_v10, %v5615_v40  ;;  %v3022_v19 = vmul.f32 %v3012_v10, %v5629_v63 }
 0x48f   :  { %v3023_v60 = vmul.f32 %v3012_v10, %v5636_v7  ;;  %v3024_v44 = vmul.f32 %v3012_v10, %v2930_v12  ;;  %v3025_v2 = vmul.f32 %v3012_v10, %v2934_v16  ;;  %v3026_v32 = vmul.f32 %v3012_v10, %v5634_v3 }
 0x490   :  { %v3051_v50 = vadd.f32 %v3034_v20, %v3029_v47  ;;  %v3036_v36 = vadd.f32 %v3034_v20, %v3014_v8  ;;  %v3037_v42 = vadd.f32 %v3034_v20, %v3015_v13  ;;  %v3038_v26 = vadd.f32 %v3034_v20, %v3016_v14 }
 0x491   :  { %v3039_v22 = vadd.f32 %v3034_v20, %v3017_v17  ;;  %v3040_v30 = vadd.f32 %v3034_v20, %v3018_v9  ;;  %v3041_v48 = vadd.f32 %v3034_v20, %v3019_v18  ;;  %v3042_v23 = vadd.f32 %v3034_v20, %v3020_v6 }
 0x492   :  { %v3052_v62 = vmax.f32 %v3036_v36, 0.0  ;;  %v3053_v35 = vmax.f32 %v3037_v42, 0.0  ;;  %v3054_v24 = vmax.f32 %v3038_v26, 0.0  ;;  %v3043_v40 = vadd.f32 %v3034_v20, %v3021_v21 }
 0x493   :  { %v3055_v27 = vmax.f32 %v3039_v22, 0.0  ;;  %v3056_v63 = vmax.f32 %v3040_v30, 0.0  ;;  %v3057_v28 = vmax.f32 %v3041_v48, 0.0  ;;  %v3058_v7 = vmax.f32 %v3042_v23, 0.0 }
 0x494   :  { %v3068_v12 = vpack.c.bf16 %v3053_v35, %v3052_v62  ;;  %v3059_v16 = vmax.f32 %v3043_v40, 0.0  ;;  %v3044_v29 = vadd.f32 %v3034_v20, %v3022_v19  ;;  %v3045_v3 = vadd.f32 %v3034_v20, %v3023_v60 }
 0x495   :  { %v3069_v31 = vpack.c.bf16 %v3055_v27, %v3054_v24  ;;  %v3070_v33 = vpack.c.bf16 %v3057_v28, %v3056_v63  ;;  %v3046_v34 = vadd.f32 %v3034_v20, %v3024_v44  ;;  %v3047_v37 = vadd.f32 %v3034_v20, %v3025_v2 }
 0x496   :  { %3205 = vmatmul.mubr.bf16.vlgmr.msra.gmra.mrb[24].mxu1 %v3068_v12  ;;  %v3071_v38 = vpack.c.bf16 %v3059_v16, %v3058_v7  ;;  %v3060_v39 = vmax.f32 %v3044_v29, 0.0  ;;  %v3061_v41 = vmax.f32 %v3045_v3, 0.0  ;;  %v3027_v43 = vmul.f32 %v3012_v10, %v5641_v11 }
 0x497   :  { %3214 = vmatprep.mubr.bf16.mxu1 %v5184_v25  ;;  %v3062_v45 = vmax.f32 %v3046_v34, 0.0  ;;  %v3063_v49 = vmax.f32 %v3047_v37, 0.0  ;;  %v3048_v51 = vadd.f32 %v3034_v20, %v3026_v32  ;;  %v3028_v52 = vmul.f32 %v3012_v10, %v5643_v15 }
 0x498   :  { %v3072_v53 = vpack.c.bf16 %v3061_v41, %v3060_v39  ;;  %v3049_v54 = vadd.f32 %v3034_v20, %v3027_v43  ;;  %v3067_v58 = vmax.f32 %v3051_v50, 0.0 }
 0x499   :  { %v3073_v55 = vpack.c.bf16 %v3063_v49, %v3062_v45  ;;  %v3064_v56 = vmax.f32 %v3048_v51, 0.0  ;;  %v3050_v57 = vadd.f32 %v3034_v20, %v3028_v52 }
 0x49a   :  { %v3065_v61 = vmax.f32 %v3049_v54, 0.0 }
 0x49b   :  { %v3066_v0 = vmax.f32 %v3050_v57, 0.0 }
 0x49c   :  { %v3074_v1 = vpack.c.bf16 %v3065_v61, %v3064_v56 }
 0x49d   :  { %v3075_v46 = vpack.c.bf16 %v3067_v58, %v3066_v0 }
 0x49e   :  { %3215 = vmatmul.mubr.bf16.gmra.mrb[28].mxu1 %v3069_v31 }
 0x49f   :  { %3224 = vmatprep.mubr.bf16.mxu1 %v5184_v25 }
 0x4a6   :  { %3225 = vmatmul.mubr.bf16.gmra.mrb[32].mxu1 %v3070_v33 }
 0x4a7   :  { %3234 = vmatprep.mubr.bf16.mxu1 %v5184_v25 }
 0x4ae   :  { %3235 = vmatmul.mubr.bf16.gmra.mrb[36].mxu1 %v3071_v38 }
 0x4af   :  { %3244 = vmatprep.mubr.bf16.mxu1 %v5184_v25 }
 0x4b6   :  { %3245 = vmatmul.mubr.bf16.gmra.mrb[40].mxu1 %v3072_v53 }
 0x4b7   :  { %3254 = vmatprep.mubr.bf16.mxu1 %v5184_v25 }
 0x4be   :  { %3255 = vmatmul.mubr.bf16.gmra.mrb[44].mxu1 %v3073_v55 }
 0x4bf   :  { %3264 = vmatprep.mubr.bf16.mxu1 %v5184_v25 }
 0x4c6   :  { %3265 = vmatmul.mubr.bf16.gmra.mrb[48].mxu1 %v3074_v1 }
 0x4c7   :  { %3274 = vmatprep.mubr.bf16.mxu1 %v5184_v25 }
 0x4ce   :  { %3275 = vmatmul.mubr.bf16.gmra.mrb[52].mxu1 %v3075_v46 }
 0x569   :  { %v5676_v11 = vpop.f32.mrb[24].mxu1 }
 0x56a   :  { %v5678_v15 = vpop.f32.mrb[25].mxu1  ;;  %v3329_v47 = vmul.f32 %v5676_v11, %v5676_v11 }
 0x56b   :  { %v5680_v10 = vpop.f32.mrb[26].mxu1  ;;  %v3330_v25 = vmul.f32 %v5678_v15, %v5678_v15 }
 0x56c   :  { %v3287_v8 = vadd.f32 %v5680_v10, %v5676_v11  ;;  %v3331_v13 = vmul.f32 %v5680_v10, %v5680_v10  ;;  %v5688_v14 = vpop.f32.mrb[27].mxu1 }
 0x56d   :  { %v3308_v17 = vadd.f32 %v5688_v14, %v5678_v15  ;;  %v3332_v9 = vmul.f32 %v5688_v14, %v5688_v14 }
 0x56e   :  { %v3361_v18 = vadd.f32 %v3331_v13, %v3329_v47 }
 0x56f   :  { %v3382_v20 = vadd.f32 %v3332_v9, %v3330_v25 }
 0x571   :  { %v5696_v6 = vpop.f32.mrb[28].mxu1 }
 0x572   :  { %v3288_v21 = vadd.f32 %v3287_v8, %v5696_v6  ;;  %v3333_v19 = vmul.f32 %v5696_v6, %v5696_v6  ;;  %v5701_v60 = vpop.f32.mrb[29].mxu1 }
 0x573   :  { %v3309_v44 = vadd.f32 %v3308_v17, %v5701_v60  ;;  %v3334_v2 = vmul.f32 %v5701_v60, %v5701_v60  ;;  %v5706_v32 = vpop.f32.mrb[30].mxu1 }
 0x574   :  { %v3362_v50 = vadd.f32 %v3361_v18, %v3333_v19  ;;  %v3289_v36 = vadd.f32 %v3288_v21, %v5706_v32  ;;  %v3335_v42 = vmul.f32 %v5706_v32, %v5706_v32  ;;  %v5711_v26 = vpop.f32.mrb[31].mxu1 }
 0x575   :  { %v3383_v22 = vadd.f32 %v3382_v20, %v3334_v2  ;;  %v3310_v30 = vadd.f32 %v3309_v44, %v5711_v26  ;;  %v3336_v48 = vmul.f32 %v5711_v26, %v5711_v26 }
 0x576   :  { %v3363_v23 = vadd.f32 %v3362_v50, %v3335_v42 }
 0x577   :  { %v3384_v62 = vadd.f32 %v3383_v22, %v3336_v48 }
 0x579   :  { %v5716_v35 = vpop.f32.mrb[32].mxu1 }
 0x57a   :  { %v3290_v24 = vadd.f32 %v3289_v36, %v5716_v35  ;;  %v3337_v40 = vmul.f32 %v5716_v35, %v5716_v35  ;;  %v5721_v27 = vpop.f32.mrb[33].mxu1 }
 0x57b   :  { %v3311_v63 = vadd.f32 %v3310_v30, %v5721_v27  ;;  %v3338_v28 = vmul.f32 %v5721_v27, %v5721_v27  ;;  %v5726_v7 = vpop.f32.mrb[34].mxu1 }
 0x57c   :  { %v3364_v12 = vadd.f32 %v3363_v23, %v3337_v40  ;;  %v3291_v16 = vadd.f32 %v3290_v24, %v5726_v7  ;;  %v3339_v29 = vmul.f32 %v5726_v7, %v5726_v7  ;;  %v5731_v3 = vpop.f32.mrb[35].mxu1 }
 0x57d   :  { %v3385_v31 = vadd.f32 %v3384_v62, %v3338_v28  ;;  %v3312_v33 = vadd.f32 %v3311_v63, %v5731_v3  ;;  %v3340_v34 = vmul.f32 %v5731_v3, %v5731_v3 }
 0x57e   :  { %v3365_v37 = vadd.f32 %v3364_v12, %v3339_v29 }
 0x57f   :  { %v3386_v38 = vadd.f32 %v3385_v31, %v3340_v34 }
 0x581   :  { %v5736_v39 = vpop.f32.mrb[36].mxu1 }
 0x582   :  { %v3292_v41 = vadd.f32 %v3291_v16, %v5736_v39  ;;  %v3341_v43 = vmul.f32 %v5736_v39, %v5736_v39  ;;  %v5741_v45 = vpop.f32.mrb[37].mxu1 }
 0x583   :  { %v3313_v49 = vadd.f32 %v3312_v33, %v5741_v45  ;;  %v3342_v51 = vmul.f32 %v5741_v45, %v5741_v45  ;;  %v5746_v52 = vpop.f32.mrb[38].mxu1 }
 0x584   :  { %v3366_v53 = vadd.f32 %v3365_v37, %v3341_v43  ;;  %v3293_v54 = vadd.f32 %v3292_v41, %v5746_v52  ;;  %v3343_v55 = vmul.f32 %v5746_v52, %v5746_v52  ;;  %v5751_v56 = vpop.f32.mrb[39].mxu1 }
 0x585   :  { %v3387_v57 = vadd.f32 %v3386_v38, %v3342_v51  ;;  %v3314_v58 = vadd.f32 %v3313_v49, %v5751_v56  ;;  %v3344_v61 = vmul.f32 %v5751_v56, %v5751_v56 }
 0x586   :  { %v3367_v0 = vadd.f32 %v3366_v53, %v3343_v55 }
 0x587   :  { %v3388_v1 = vadd.f32 %v3387_v57, %v3344_v61 }
 0x589   :  { %v5756_v46 = vpop.f32.mrb[40].mxu1 }
 0x58a   :  { %v3294_v47 = vadd.f32 %v3293_v54, %v5756_v46  ;;  %v3345_v8 = vmul.f32 %v5756_v46, %v5756_v46  ;;  %v5761_v13 = vpop.f32.mrb[41].mxu1 }
 0x58b   :  { %v3315_v25 = vadd.f32 %v3314_v58, %v5761_v13  ;;  %v3346_v17 = vmul.f32 %v5761_v13, %v5761_v13  ;;  %v5766_v9 = vpop.f32.mrb[42].mxu1 }
 0x58c   :  { %v3368_v18 = vadd.f32 %v3367_v0, %v3345_v8  ;;  %v3295_v20 = vadd.f32 %v3294_v47, %v5766_v9  ;;  %v3347_v21 = vmul.f32 %v5766_v9, %v5766_v9  ;;  %v5771_v19 = vpop.f32.mrb[43].mxu1 }
 0x58d   :  { %v3389_v44 = vadd.f32 %v3388_v1, %v3346_v17  ;;  %v3316_v2 = vadd.f32 %v3315_v25, %v5771_v19  ;;  %v3348_v50 = vmul.f32 %v5771_v19, %v5771_v19 }
 0x58e   :  { %v3369_v36 = vadd.f32 %v3368_v18, %v3347_v21 }
 0x58f   :  { %v3390_v42 = vadd.f32 %v3389_v44, %v3348_v50 }
 0x591   :  { %v5776_v22 = vpop.f32.mrb[44].mxu1 }
 0x592   :  { %v3296_v30 = vadd.f32 %v3295_v20, %v5776_v22  ;;  %v3349_v48 = vmul.f32 %v5776_v22, %v5776_v22  ;;  %v5781_v23 = vpop.f32.mrb[45].mxu1 }
 0x593   :  { %v3317_v62 = vadd.f32 %v3316_v2, %v5781_v23  ;;  %v3350_v24 = vmul.f32 %v5781_v23, %v5781_v23  ;;  %v5786_v40 = vpop.f32.mrb[46].mxu1 }
 0x594   :  { %v3370_v63 = vadd.f32 %v3369_v36, %v3349_v48  ;;  %v3297_v28 = vadd.f32 %v3296_v30, %v5786_v40  ;;  %v3351_v12 = vmul.f32 %v5786_v40, %v5786_v40  ;;  %v5791_v16 = vpop.f32.mrb[47].mxu1 }
 0x595   :  { %v3391_v29 = vadd.f32 %v3390_v42, %v3350_v24  ;;  %v3318_v31 = vadd.f32 %v3317_v62, %v5791_v16  ;;  %v3352_v33 = vmul.f32 %v5791_v16, %v5791_v16 }
 0x596   :  { %v3371_v34 = vadd.f32 %v3370_v63, %v3351_v12 }
 0x597   :  { %v3392_v37 = vadd.f32 %v3391_v29, %v3352_v33 }
 0x599   :  { %v5796_v38 = vpop.f32.mrb[48].mxu1 }
 0x59a   :  { %v3298_v41 = vadd.f32 %v3297_v28, %v5796_v38  ;;  %v3353_v43 = vmul.f32 %v5796_v38, %v5796_v38  ;;  %v5801_v49 = vpop.f32.mrb[49].mxu1 }
 0x59b   :  { %v3319_v51 = vadd.f32 %v3318_v31, %v5801_v49  ;;  %v3354_v53 = vmul.f32 %v5801_v49, %v5801_v49  ;;  %v5806_v54 = vpop.f32.mrb[50].mxu1 }
 0x59c   :  { %v3372_v55 = vadd.f32 %v3371_v34, %v3353_v43  ;;  %v3299_v57 = vadd.f32 %v3298_v41, %v5806_v54  ;;  %v3355_v58 = vmul.f32 %v5806_v54, %v5806_v54  ;;  %v5811_v61 = vpop.f32.mrb[51].mxu1 }
 0x59d   :  { %v3393_v0 = vadd.f32 %v3392_v37, %v3354_v53  ;;  %v3320_v1 = vadd.f32 %v3319_v51, %v5811_v61  ;;  %v3356_v47 = vmul.f32 %v5811_v61, %v5811_v61 }
 0x59e   :  { %v3373_v8 = vadd.f32 %v3372_v55, %v3355_v58 }
 0x59f   :  { %v3394_v25 = vadd.f32 %v3393_v0, %v3356_v47 }
 0x5a1   :  { %v5816_v17 = vpop.f32.mrb[52].mxu1 }
 0x5a2   :  { %v3300_v18 = vadd.f32 %v3299_v57, %v5816_v17  ;;  %v3357_v20 = vmul.f32 %v5816_v17, %v5816_v17  ;;  %v5821_v21 = vpop.f32.mrb[53].mxu1 }
 0x5a3   :  { %v3321_v44 = vadd.f32 %v3320_v1, %v5821_v21  ;;  %v3358_v2 = vmul.f32 %v5821_v21, %v5821_v21  ;;  %v5826_v50 = vpop.f32.mrb[54].mxu1 }
 0x5a4   :  { %v3374_v36 = vadd.f32 %v3373_v8, %v3357_v20  ;;  %v3301_v42 = vadd.f32 %v3300_v18, %v5826_v50  ;;  %v3359_v30 = vmul.f32 %v5826_v50, %v5826_v50  ;;  %v5831_v48 = vpop.f32.mrb[55].mxu1  ;;  %v4906_v20 = vld [vmem:[%s6064_s4 + $0x40] sm:$0xff]  }
 0x5a5   :  { %v3395_v62 = vadd.f32 %v3394_v25, %v3358_v2  ;;  %v3322_v24 = vadd.f32 %v3321_v44, %v5831_v48  ;;  %v3360_v63 = vmul.f32 %v5831_v48, %v5831_v48  ;;  %v4907_v44 = vld [vmem:[%s6064_s4] sm:$0xff]   ;;  %v4908_v2 = vld [vmem:[%s6064_s4 + $0x48] sm:$0xff]   ;;  %4266 = vmatprep.subr.bf16.mxu1 %v4906_v20  ;;  %v4919_v20 = vld [vmem:[%s6064_s4 + $0x30] sm:$0xff]  }
 0x5a6   :  { %v3302_v28 = vrot.slane %v3301_v42, 4  ;;  %v3375_v12 = vadd.f32 %v3374_v36, %v3359_v30  ;;  %4267 = vmatpush3.bf16.msra.mxu1 %v4907_v44  ;;  %v4920_v44 = vld [vmem:[%s6064_s4 + $0x78] sm:$0xff]  }
 0x5a7   :  { %v3323_v29 = vrot.slane %v3322_v24, 4  ;;  %v3396_v31 = vadd.f32 %v3395_v62, %v3360_v63  ;;  %4268 = vmatprep.subr.bf16.mxu1 %v4908_v2  ;;  %v4921_v2 = vld [vmem:[%s6064_s4 + $0x38] sm:$0xff]  }
 0x5a8   :  { %v3376_v33 = vrot.slane %v3375_v12, 4  ;;  %v3303_v34 = vadd.f32 %v3302_v28, %v3301_v42 }
 0x5a9   :  { %v3397_v37 = vrot.slane %v3396_v31, 4  ;;  %v3324_v41 = vadd.f32 %v3323_v29, %v3322_v24  ;;  %v4909_v24 = vld [vmem:[%s6064_s4 + $0x8] sm:$0xff]   ;;  %v4911_v29 = vld [vmem:[%s6064_s4 + $0x10] sm:$0xff]  }
 0x5aa   :  { %v3377_v43 = vadd.f32 %v3376_v33, %v3375_v12  ;;  %v3304_v51 = vrot.slane %v3303_v34, 2  ;;  %4269 = vmatpush3.bf16.msra.mxu1 %v4909_v24  ;;  %v4910_v12 = vld [vmem:[%s6064_s4 + $0x50] sm:$0xff]  }
 0x5ab   :  { %v3398_v53 = vadd.f32 %v3397_v37, %v3396_v31  ;;  %v3325_v55 = vrot.slane %v3324_v41, 2  ;;  %4270 = vmatprep.subr.bf16.mxu1 %v4910_v12 }
 0x5ac   :  { %v3305_v57 = vadd.f32 %v3304_v51, %v3303_v34  ;;  %v3378_v58 = vrot.slane %v3377_v43, 2 }
 0x5ad   :  { %v3326_v0 = vadd.f32 %v3325_v55, %v3324_v41  ;;  %v3399_v1 = vrot.slane %v3398_v53, 2 }
 0x5ae   :  { %v3306_v47 = vrot.slane %v3305_v57, 1  ;;  %v3379_v8 = vadd.f32 %v3378_v58, %v3377_v43  ;;  %4271 = vmatpush3.bf16.msra.mxu1 %v4911_v29  ;;  %v4912_v58 = vld [vmem:[%s6064_s4 + $0x58] sm:$0xff]  }
 0x5af   :  { %v3327_v25 = vrot.slane %v3326_v0, 1  ;;  %v3400_v18 = vadd.f32 %v3399_v1, %v3398_v53  ;;  %v4914_v1 = vld [vmem:[%s6064_s4 + $0x60] sm:$0xff]   ;;  %4272 = vmatprep.subr.bf16.mxu1 %v4912_v58 }
 0x5b0   :  { %v3307_v36 = vadd.f32 %v3306_v47, %v3305_v57  ;;  %v3380_v42 = vrot.slane %v3379_v8, 1  ;;  %v4915_v47 = vld [vmem:[%s6064_s4 + $0x20] sm:$0xff]  }
 0x5b1   :  { %v3328_v30 = vadd.f32 %v3327_v25, %v3326_v0  ;;  %v3401_v62 = vrot.slane %v3400_v18, 1  ;;  %v4913_v0 = vld [vmem:[%s6064_s4 + $0x18] sm:$0xff]   ;;  %v4917_v25 = vld [vmem:[%s6064_s4 + $0x28] sm:$0xff]  }
 0x5b2   :  { %3404 = vrot.lane.b32.xlu0 %v3307_v36, %s5185_s28  ;;  %v3381_v63 = vadd.f32 %v3380_v42, %v3379_v8  ;;  %4273 = vmatpush3.bf16.msra.mxu1 %v4913_v0  ;;  %v4916_v8 = vld [vmem:[%s6064_s4 + $0x68] sm:$0xff]  }
 0x5b3   :  { %3410 = vrot.lane.b32.xlu1 %v3328_v30, %s5185_s28  ;;  %v3402_v28 = vadd.f32 %v3401_v62, %v3400_v18  ;;  %4274 = vmatprep.subr.bf16.mxu1 %v4914_v1  ;;  %v4918_v18 = vld [vmem:[%s6064_s4 + $0x70] sm:$0xff]  }
 0x5b6   :  { %3421 = vrot.lane.b32.xlu0 %v3381_v63, %s5185_s28  ;;  %4275 = vmatpush3.bf16.msra.mxu1 %v4915_v47 }
 0x5b7   :  { %3427 = vrot.lane.b32.xlu1 %v3402_v28, %s5185_s28  ;;  %4276 = vmatprep.subr.bf16.mxu1 %v4916_v8 }
 0x5ba   :  { %4277 = vmatpush3.bf16.msra.mxu1 %v4917_v25 }
 0x5bb   :  { %4278 = vmatprep.subr.bf16.mxu1 %v4918_v18 }
 0x5be   :  { %4279 = vmatpush3.bf16.msra.mxu1 %v4919_v20 }
 0x5bf   :  { %4280 = vmatprep.subr.bf16.mxu1 %v4920_v44 }
 0x5c2   :  { %4281 = vmatpush3.bf16.msra.mxu1 %v4921_v2 }
 0x624   :  { %v3405_v31 = vpop.permute.xlu0 %3404 }
 0x625   :  { %v3407_v33 = vadd.f32 %v3405_v31, %v3307_v36  ;;  %v3411_v34 = vpop.permute.xlu1 %3410 }
 0x627   :  { %v3408_v37 = vadd.f32 %v3407_v33, %v3328_v30 }
 0x628   :  { %v3422_v41 = vpop.permute.xlu0 %3421 }
 0x629   :  { %v3413_v43 = vadd.f32 %v3411_v34, %v3408_v37  ;;  %v3424_v51 = vadd.f32 %v3422_v41, %v3381_v63  ;;  %v3428_v55 = vpop.permute.xlu1 %3427  ;;  %v3285_v37 = vld [vmem:[#allocation13] sm:$0x3] }
 0x62b   :  { %v3425_v53 = vadd.f32 %v3424_v51, %v3402_v28  ;;  %3415 = vrot.lane.b32.xlu0 %v3413_v43, %s5185_s28 }
 0x62d   :  { %v3430_v57 = vadd.f32 %v3428_v55, %v3425_v53 }
 0x62f   :  { %3432 = vrot.lane.b32.xlu1 %v3430_v57, %s5185_s28 }
 0x69d   :  { %v3416_v36 = vpop.permute.xlu0 %3415 }
 0x69e   :  { %v3419_v42 = vsel %vm3418_vm0, %v3413_v43, %v3416_v36  ;;  %v3286_v36 = vld [vmem:[#allocation15] sm:$0x3] }
 0x69f   :  { %v3436_v30 = vmul.f32 0.001953125, %v3419_v42 }
 0x6a1   :  { %v3433_v62 = vpop.permute.xlu1 %3432  ;;  %v3438_v28 = vmul.f32 %v3436_v30, %v3436_v30 }
 0x6a2   :  { %v3435_v24 = vsel %vm3418_vm0, %v3430_v57, %v3433_v62 }
 0x6a3   :  { %v3437_v63 = vmul.f32 0.001953125, %v3435_v24 }
 0x6a5   :  { %v3439_v12 = vsub.f32 %v3437_v63, %v3438_v28 }
 0x6a7   :  { %v3440_v29 = vadd.f32 1e-05, %v3439_v12 }
 0x6a9   :  { %4928 = vrsqrt.f32 %v3440_v29 }
 0x6b3   :  { %v4929_v31 = vpop.eup %4928 }
 0x6b4   :  { %v3443_v33 = vcombine.low %v4929_v31, %v4929_v31 }
 0x6b6   :  { %v3450_v34 = vrot.slane %v3443_v33, %v5554_v59 }
 0x6b8   :  { %v3457_v41 = vrot.slane %v3450_v34, %v5554_v59 }
 0x6ba   :  { %v3459_v51 = vmul.f32 %v3457_v41, %v3285_v37 }
 0x6bc   :  { %v3464_v53 = vrot.slane %v3459_v51, %v5558_v4  ;;  %v3468_v43 = vrot.slane %v3459_v51, %v5560_v5 }
 0x6be   :  { %v3471_v55 = vmul.f32 %v3464_v53, %v3436_v30  ;;  %v3472_v58 = vmul.f32 %v3468_v43, %v3436_v30  ;;  %v3493_v0 = vmul.f32 %v3468_v43, %v5678_v15  ;;  %v3495_v1 = vmul.f32 %v3468_v43, %v5688_v14 }
 0x6bf   :  { %v3492_v47 = vmul.f32 %v3464_v53, %v5676_v11  ;;  %v3494_v8 = vmul.f32 %v3464_v53, %v5680_v10  ;;  %v3497_v25 = vmul.f32 %v3468_v43, %v5701_v60  ;;  %v3499_v20 = vmul.f32 %v3468_v43, %v5711_v26 }
 0x6c0   :  { %v3475_v57 = vcombine.low %v3471_v55, %v3472_v58  ;;  %v3496_v44 = vmul.f32 %v3464_v53, %v5696_v6  ;;  %v3498_v2 = vmul.f32 %v3464_v53, %v5706_v32  ;;  %v3501_v42 = vmul.f32 %v3468_v43, %v5721_v27 }
 0x6c1   :  { %v3503_v15 = vmul.f32 %v3468_v43, %v5731_v3  ;;  %v3500_v14 = vmul.f32 %v3464_v53, %v5716_v35  ;;  %v3502_v11 = vmul.f32 %v3464_v53, %v5726_v7  ;;  %v3505_v60 = vmul.f32 %v3468_v43, %v5741_v45 }
 0x6c2   :  { %v3482_v18 = vrot.slane %v3475_v57, %v5554_v59  ;;  %v3507_v30 = vmul.f32 %v3468_v43, %v5751_v56  ;;  %v3504_v26 = vmul.f32 %v3464_v53, %v5736_v39  ;;  %v3506_v6 = vmul.f32 %v3464_v53, %v5746_v52 }
 0x6c3   :  { %v3509_v32 = vmul.f32 %v3468_v43, %v5761_v13  ;;  %v3511_v27 = vmul.f32 %v3468_v43, %v5771_v19  ;;  %v3508_v3 = vmul.f32 %v3464_v53, %v5756_v46  ;;  %v3510_v35 = vmul.f32 %v3464_v53, %v5766_v9 }
 0x6c4   :  { %v3489_v10 = vrot.slane %v3482_v18, %v5554_v59  ;;  %v5911_v7 = vmul.f32 %v3468_v43, %v5781_v23  ;;  %v5914_v59 = vmul.f32 %v3468_v43, %v5791_v16  ;;  %v5917_v45 = vmul.f32 %v3464_v53, %v5776_v22 }
 0x6c5   :  { %v5920_v39 = vmul.f32 %v3464_v53, %v5786_v40  ;;  %v5923_v52 = vmul.f32 %v3464_v53, %v5816_v17  ;;  %v5926_v56 = vmul.f32 %v3464_v53, %v5826_v50  ;;  %v5935_v9 = vmul.f32 %v3468_v43, %v5801_v49 }
 0x6c6   :  { %v3491_v62 = vsub.f32 %v3286_v36, %v3489_v10  ;;  %v5938_v19 = vmul.f32 %v3468_v43, %v5811_v61  ;;  %v5941_v22 = vmul.f32 %v3464_v53, %v5796_v38  ;;  %v5944_v23 = vmul.f32 %v3464_v53, %v5806_v54 }
 0x6c7   :  { %v5947_v40 = vmul.f32 %v3468_v43, %v5821_v21 }
 0x6c8   :  { %v5929_v46 = vrot.slane %v3491_v62, %v5558_v4  ;;  %v5932_v13 = vrot.slane %v3491_v62, %v5560_v5  ;;  %v5950_v4 = vmul.f32 %v3468_v43, %v5831_v48 }
 0x6ca   :  { %v3536_v5 = vadd.f32 %v5932_v13, %v3493_v0  ;;  %v3538_v16 = vadd.f32 %v5932_v13, %v3495_v1  ;;  %v3535_v49 = vadd.f32 %v5929_v46, %v3492_v47  ;;  %v3537_v61 = vadd.f32 %v5929_v46, %v3494_v8 }
 0x6cb   :  { %v3540_v38 = vadd.f32 %v5932_v13, %v3497_v25  ;;  %v3542_v17 = vadd.f32 %v5932_v13, %v3499_v20  ;;  %v3539_v54 = vadd.f32 %v5929_v46, %v3496_v44  ;;  %v3541_v21 = vadd.f32 %v5929_v46, %v3498_v2 }
 0x6cc   :  { %v3568_v50 = vmax.f32 %v3536_v5, 0.0  ;;  %v3570_v24 = vmax.f32 %v3538_v16, 0.0  ;;  %v3567_v48 = vmax.f32 %v3535_v49, 0.0  ;;  %v3569_v63 = vmax.f32 %v3537_v61, 0.0 }
 0x6cd   :  { %v3572_v28 = vmax.f32 %v3540_v38, 0.0  ;;  %v3574_v12 = vmax.f32 %v3542_v17, 0.0  ;;  %v3571_v29 = vmax.f32 %v3539_v54, 0.0  ;;  %v3573_v31 = vmax.f32 %v3541_v21, 0.0 }
 0x6ce   :  { %v3600_v33 = vpack.c.bf16 %v3570_v24, %v3568_v50  ;;  %v3599_v34 = vpack.c.bf16 %v3569_v63, %v3567_v48  ;;  %v3544_v37 = vadd.f32 %v5932_v13, %v3501_v42  ;;  %v3546_v41 = vadd.f32 %v5932_v13, %v3503_v15 }
 0x6cf   :  { %v3602_v51 = vpack.c.bf16 %v3574_v12, %v3572_v28  ;;  %v3601_v53 = vpack.c.bf16 %v3573_v31, %v3571_v29  ;;  %v3543_v43 = vadd.f32 %v5929_v46, %v3500_v14  ;;  %v3545_v55 = vadd.f32 %v5929_v46, %v3502_v11 }
 0x6d0   :  { %3775 = vmatprep.mubr.bf16.mxu1 %v3600_v33  ;;  %v3576_v58 = vmax.f32 %v3544_v37, 0.0  ;;  %v3578_v57 = vmax.f32 %v3546_v41, 0.0  ;;  %v3548_v0 = vadd.f32 %v5932_v13, %v3505_v60  ;;  %v3550_v1 = vadd.f32 %v5932_v13, %v3507_v30 }
 0x6d1   :  { %3776 = vmatmul.mubr.bf16.vlgmr.msra.gmra.mrb[56].mxu1 %v3599_v34  ;;  %v3575_v47 = vmax.f32 %v3543_v43, 0.0  ;;  %v3577_v8 = vmax.f32 %v3545_v55, 0.0  ;;  %v3547_v25 = vadd.f32 %v5929_v46, %v3504_v26  ;;  %v3549_v18 = vadd.f32 %v5929_v46, %v3506_v6 }
 0x6d2   :  { %3783 = vmatprep.mubr.bf16.mxu1 %v3602_v51  ;;  %v3604_v20 = vpack.c.bf16 %v3578_v57, %v3576_v58  ;;  %v3580_v44 = vmax.f32 %v3548_v0, 0.0  ;;  %v3582_v2 = vmax.f32 %v3550_v1, 0.0  ;;  %v3552_v36 = vadd.f32 %v5932_v13, %v3509_v32 }
 0x6d3   :  { %v3603_v42 = vpack.c.bf16 %v3577_v8, %v3575_v47  ;;  %v3579_v15 = vmax.f32 %v3547_v25, 0.0  ;;  %v3581_v14 = vmax.f32 %v3549_v18, 0.0  ;;  %v3554_v11 = vadd.f32 %v5932_v13, %v3511_v27 }
 0x6d4   :  { %v3606_v10 = vpack.c.bf16 %v3582_v2, %v3580_v44  ;;  %v3584_v60 = vmax.f32 %v3552_v36, 0.0  ;;  %v3551_v30 = vadd.f32 %v5929_v46, %v3508_v3  ;;  %v3553_v62 = vadd.f32 %v5929_v46, %v3510_v35 }
 0x6d5   :  { %v3605_v26 = vpack.c.bf16 %v3581_v14, %v3579_v15  ;;  %v3586_v5 = vmax.f32 %v3554_v11, 0.0  ;;  %v3556_v6 = vadd.f32 %v5932_v13, %v5911_v7  ;;  %v3558_v16 = vadd.f32 %v5932_v13, %v5914_v59 }
 0x6d6   :  { %v3583_v32 = vmax.f32 %v3551_v30, 0.0  ;;  %v3585_v49 = vmax.f32 %v3553_v62, 0.0  ;;  %v3555_v61 = vadd.f32 %v5929_v46, %v5917_v45  ;;  %v3557_v27 = vadd.f32 %v5929_v46, %v5920_v39 }
 0x6d7   :  { %v3608_v38 = vpack.c.bf16 %v3586_v5, %v3584_v60  ;;  %v3588_v3 = vmax.f32 %v3556_v6, 0.0  ;;  %v3590_v17 = vmax.f32 %v3558_v16, 0.0  ;;  %v3560_v35 = vadd.f32 %v5932_v13, %v5935_v9 }
 0x6d8   :  { %v3607_v54 = vpack.c.bf16 %v3585_v49, %v3583_v32  ;;  %v3587_v21 = vmax.f32 %v3555_v61, 0.0  ;;  %v3589_v7 = vmax.f32 %v3557_v27, 0.0  ;;  %v3562_v59 = vadd.f32 %v5932_v13, %v5938_v19 }
 0x6d9   :  { %3784 = vmatmul.mubr.bf16.gmra.mrb[60].mxu1 %v3601_v53  ;;  %v3610_v50 = vpack.c.bf16 %v3590_v17, %v3588_v3  ;;  %v3592_v24 = vmax.f32 %v3560_v35, 0.0  ;;  %v3559_v45 = vadd.f32 %v5929_v46, %v5941_v22  ;;  %v3561_v39 = vadd.f32 %v5929_v46, %v5944_v23 }
 0x6da   :  { %3791 = vmatprep.mubr.bf16.mxu1 %v3604_v20  ;;  %v3609_v48 = vpack.c.bf16 %v3589_v7, %v3587_v21  ;;  %v3594_v63 = vmax.f32 %v3562_v59, 0.0  ;;  %v3564_v9 = vadd.f32 %v5932_v13, %v5947_v40  ;;  %v3566_v28 = vadd.f32 %v5932_v13, %v5950_v4 }
 0x6db   :  { %v3591_v12 = vmax.f32 %v3559_v45, 0.0  ;;  %v3593_v19 = vmax.f32 %v3561_v39, 0.0  ;;  %v3563_v29 = vadd.f32 %v5929_v46, %v5923_v52  ;;  %v3565_v22 = vadd.f32 %v5929_v46, %v5926_v56 }
 0x6dc   :  { %v3612_v31 = vpack.c.bf16 %v3594_v63, %v3592_v24  ;;  %v3596_v33 = vmax.f32 %v3564_v9, 0.0  ;;  %v3598_v23 = vmax.f32 %v3566_v28, 0.0 }
 0x6dd   :  { %v3611_v34 = vpack.c.bf16 %v3593_v19, %v3591_v12  ;;  %v3595_v37 = vmax.f32 %v3563_v29, 0.0  ;;  %v3597_v41 = vmax.f32 %v3565_v22, 0.0 }
 0x6de   :  { %v3614_v51 = vpack.c.bf16 %v3598_v23, %v3596_v33 }
 0x6df   :  { %v3613_v53 = vpack.c.bf16 %v3597_v41, %v3595_v37 }
 0x6e1   :  { %3792 = vmatmul.mubr.bf16.gmra.mrb[64].mxu1 %v3603_v42 }
 0x6e2   :  { %3799 = vmatprep.mubr.bf16.mxu1 %v3606_v10 }
 0x6e9   :  { %3800 = vmatmul.mubr.bf16.gmra.mrb[68].mxu1 %v3605_v26 }
 0x6ea   :  { %3807 = vmatprep.mubr.bf16.mxu1 %v3608_v38 }
 0x6f1   :  { %3808 = vmatmul.mubr.bf16.gmra.mrb[72].mxu1 %v3607_v54 }
 0x6f2   :  { %3815 = vmatprep.mubr.bf16.mxu1 %v3610_v50 }
 0x6f9   :  { %3816 = vmatmul.mubr.bf16.gmra.mrb[76].mxu1 %v3609_v48 }
 0x6fa   :  { %3823 = vmatprep.mubr.bf16.mxu1 %v3612_v31 }
 0x701   :  { %3824 = vmatmul.mubr.bf16.gmra.mrb[80].mxu1 %v3611_v34 }
 0x702   :  { %3831 = vmatprep.mubr.bf16.mxu1 %v3614_v51 }
 0x709   :  { %3832 = vmatmul.mubr.bf16.gmra.mrb[84].mxu1 %v3613_v53 }
 0x7a4   :  { %v4282_v52 = vpop.f32.mrb[56].mxu1 }
 0x7a5   :  { %v4283_v56 = vpop.f32.mrb[57].mxu1 }
 0x7a6   :  { %v4284_v46 = vadd.f32 %v4283_v56, %v4282_v52  ;;  %v4285_v13 = vpop.f32.mrb[58].mxu1 }
 0x7a7   :  { %v4286_v40 = vpop.f32.mrb[59].mxu1 }
 0x7a8   :  { %4930 = vtanh.f32 %v4284_v46  ;;  %v4287_v4 = vadd.f32 %v4286_v40, %v4285_v13 }
 0x7aa   :  { %4932 = vtanh.f32 %v4287_v4 }
 0x7ac   :  { %v4288_v43 = vpop.f32.mrb[60].mxu1 }
 0x7ad   :  { %v4289_v55 = vpop.f32.mrb[61].mxu1 }
 0x7ae   :  { %v4290_v58 = vadd.f32 %v4289_v55, %v4288_v43  ;;  %v4291_v57 = vpop.f32.mrb[62].mxu1 }
 0x7af   :  { %v4292_v0 = vpop.f32.mrb[63].mxu1 }
 0x7b0   :  { %4934 = vtanh.f32 %v4290_v58  ;;  %v4293_v1 = vadd.f32 %v4292_v0, %v4291_v57 }
 0x7b2   :  { %v4931_v47 = vpop.eup %4930  ;;  %4936 = vtanh.f32 %v4293_v1 }
 0x7b3   :  { %3857 = vst.msk [vmem:[%s6071_s11] sm:$0xff] %vm3856_vm1, %v4931_v47 }
 0x7b4   :  { %v4933_v8 = vpop.eup %4932  ;;  %v4294_v25 = vpop.f32.mrb[64].mxu1 }
 0x7b5   :  { %3858 = vst.msk [vmem:[%s6071_s11 + $0x8] sm:$0xff] %vm3856_vm1, %v4933_v8  ;;  %v4295_v18 = vpop.f32.mrb[65].mxu1 }
 0x7b6   :  { %v4296_v20 = vadd.f32 %v4295_v18, %v4294_v25  ;;  %v4297_v44 = vpop.f32.mrb[66].mxu1 }
 0x7b7   :  { %v4298_v2 = vpop.f32.mrb[67].mxu1 }
 0x7b8   :  { %4938 = vtanh.f32 %v4296_v20  ;;  %v4299_v36 = vadd.f32 %v4298_v2, %v4297_v44 }
 0x7ba   :  { %v4935_v42 = vpop.eup %4934  ;;  %4940 = vtanh.f32 %v4299_v36 }
 0x7bb   :  { %3859 = vst.msk [vmem:[%s6071_s11 + $0x10] sm:$0xff] %vm3856_vm1, %v4935_v42 }
 0x7bc   :  { %v4937_v15 = vpop.eup %4936  ;;  %v4300_v14 = vpop.f32.mrb[68].mxu1 }
 0x7bd   :  { %3860 = vst.msk [vmem:[%s6071_s11 + $0x18] sm:$0xff] %vm3856_vm1, %v4937_v15  ;;  %v4301_v11 = vpop.f32.mrb[69].mxu1 }
 0x7be   :  { %v4302_v10 = vadd.f32 %v4301_v11, %v4300_v14  ;;  %v4303_v60 = vpop.f32.mrb[70].mxu1 }
 0x7bf   :  { %v4304_v30 = vpop.f32.mrb[71].mxu1 }
 0x7c0   :  { %4942 = vtanh.f32 %v4302_v10  ;;  %v4305_v62 = vadd.f32 %v4304_v30, %v4303_v60 }
 0x7c2   :  { %v4939_v26 = vpop.eup %4938  ;;  %4944 = vtanh.f32 %v4305_v62 }
 0x7c3   :  { %3861 = vst.msk [vmem:[%s6071_s11 + $0x20] sm:$0xff] %vm3856_vm1, %v4939_v26 }
 0x7c4   :  { %v4941_v5 = vpop.eup %4940  ;;  %v4306_v6 = vpop.f32.mrb[72].mxu1 }
 0x7c5   :  { %3862 = vst.msk [vmem:[%s6071_s11 + $0x28] sm:$0xff] %vm3856_vm1, %v4941_v5  ;;  %v4307_v16 = vpop.f32.mrb[73].mxu1 }
 0x7c6   :  { %v4308_v32 = vadd.f32 %v4307_v16, %v4306_v6  ;;  %v4309_v49 = vpop.f32.mrb[74].mxu1 }
 0x7c7   :  { %v4310_v61 = vpop.f32.mrb[75].mxu1 }
 0x7c8   :  { %4946 = vtanh.f32 %v4308_v32  ;;  %v4311_v27 = vadd.f32 %v4310_v61, %v4309_v49 }
 0x7ca   :  { %v4943_v38 = vpop.eup %4942  ;;  %4948 = vtanh.f32 %v4311_v27 }
 0x7cb   :  { %3863 = vst.msk [vmem:[%s6071_s11 + $0x30] sm:$0xff] %vm3856_vm1, %v4943_v38 }
 0x7cc   :  { %v4945_v3 = vpop.eup %4944  ;;  %v4312_v17 = vpop.f32.mrb[76].mxu1 }
 0x7cd   :  { %3864 = vst.msk [vmem:[%s6071_s11 + $0x38] sm:$0xff] %vm3856_vm1, %v4945_v3  ;;  %v4313_v35 = vpop.f32.mrb[77].mxu1 }
 0x7ce   :  { %v4314_v54 = vadd.f32 %v4313_v35, %v4312_v17  ;;  %v4315_v21 = vpop.f32.mrb[78].mxu1 }
 0x7cf   :  { %v4316_v7 = vpop.f32.mrb[79].mxu1 }
 0x7d0   :  { %4950 = vtanh.f32 %v4314_v54  ;;  %v4317_v59 = vadd.f32 %v4316_v7, %v4315_v21 }
 0x7d2   :  { %v4947_v50 = vpop.eup %4946  ;;  %4952 = vtanh.f32 %v4317_v59 }
 0x7d3   :  { %3865 = vst.msk [vmem:[%s6071_s11 + $0x40] sm:$0xff] %vm3856_vm1, %v4947_v50 }
 0x7d4   :  { %v4949_v24 = vpop.eup %4948  ;;  %v4318_v45 = vpop.f32.mrb[80].mxu1 }
 0x7d5   :  { %3866 = vst.msk [vmem:[%s6071_s11 + $0x48] sm:$0xff] %vm3856_vm1, %v4949_v24  ;;  %v4319_v39 = vpop.f32.mrb[81].mxu1 }
 0x7d6   :  { %v4320_v48 = vadd.f32 %v4319_v39, %v4318_v45  ;;  %v4321_v63 = vpop.f32.mrb[82].mxu1 }
 0x7d7   :  { %v4322_v9 = vpop.f32.mrb[83].mxu1 }
 0x7d8   :  { %4954 = vtanh.f32 %v4320_v48  ;;  %v4323_v28 = vadd.f32 %v4322_v9, %v4321_v63 }
 0x7da   :  { %v4951_v12 = vpop.eup %4950  ;;  %4956 = vtanh.f32 %v4323_v28 }
 0x7db   :  { %3867 = vst.msk [vmem:[%s6071_s11 + $0x50] sm:$0xff] %vm3856_vm1, %v4951_v12 }
 0x7dc   :  { %v4953_v19 = vpop.eup %4952  ;;  %v4324_v29 = vpop.f32.mrb[84].mxu1 }
 0x7dd   :  { %3868 = vst.msk [vmem:[%s6071_s11 + $0x58] sm:$0xff] %vm3856_vm1, %v4953_v19  ;;  %v4325_v22 = vpop.f32.mrb[85].mxu1 }
 0x7de   :  { %v4326_v31 = vadd.f32 %v4325_v22, %v4324_v29  ;;  %v4327_v33 = vpop.f32.mrb[86].mxu1 }
 0x7df   :  { %v4328_v23 = vpop.f32.mrb[87].mxu1 }
 0x7e0   :  { %4958 = vtanh.f32 %v4326_v31  ;;  %v4329_v34 = vadd.f32 %v4328_v23, %v4327_v33 }
 0x7e2   :  { %v4955_v37 = vpop.eup %4954  ;;  %4960 = vtanh.f32 %v4329_v34 }
 0x7e3   :  { %3869 = vst.msk [vmem:[%s6071_s11 + $0x60] sm:$0xff] %vm3856_vm1, %v4955_v37 }
 0x7e4   :  { %v4957_v41 = vpop.eup %4956 }
 0x7e5   :  { %3870 = vst.msk [vmem:[%s6071_s11 + $0x68] sm:$0xff] %vm3856_vm1, %v4957_v41 }
 0x7ea   :  { %v4959_v51 = vpop.eup %4958 }
 0x7eb   :  { %3871 = vst.msk [vmem:[%s6071_s11 + $0x70] sm:$0xff] %vm3856_vm1, %v4959_v51 }
 0x7ec   :  { %v4961_v53 = vpop.eup %4960 }
 0x7ed   :  { %3872 = vst.msk [vmem:[%s6071_s11 + $0x78] sm:$0xff] %vm3856_vm1, %v4961_v53 }
 0x7ee   :  { %3877 = vsyncpa [#allocation3], 1 }
 0x7ef   :  { %3878 = vsyncpa [#allocation5], 1 }
 0x7f0   :  { %3879 = vsyncpa [#allocation8], 1 }
 0x7f1   :  { %3880 = vsyncpa [#allocation11], 1 }
 0x7f2   :  { %3881 = vsyncpa [#allocation14], 1 }

</bundles_post_ra>
